<compile_context>
chip_gen: v7x
topology: tpu7x:2x2x1
jax: 0.10.0
libtpu: 0.0.40
codegen_flags: <defaults>
</compile_context>

<pallas_src>
import functools
import math

import jax
import jax.numpy as jnp
from jax.experimental import pallas as pl
from jax.experimental.pallas import tpu as pltpu


# ----------------------------- in-kernel helpers -----------------------------

def _erf(z):
    # Abramowitz & Stegun 7.1.26 (|err| < 1.5e-7): only exp/abs/where -> clean Mosaic lowering.
    sgn = jnp.where(z >= 0.0, 1.0, -1.0)
    a = jnp.abs(z)
    t = 1.0 / (1.0 + 0.3275911 * a)
    poly = t * (0.254829592 + t * (-0.284496736 + t * (1.421413741
           + t * (-1.453152027 + t * 1.061405429))))
    return sgn * (1.0 - poly * jnp.exp(-a * a))


def _gelu_exact(x):
    # matches torch nn.GELU() (erf-based)
    return 0.5 * x * (1.0 + _erf(x * 0.7071067811865476))


# ------------------------------ fused block kernel ----------------------------

def _block_kernel(x_ref, wqkv_ref, bqkv_ref, cw_ref, cb_ref, cos_ref, sin_ref,
                  wo_ref, bo_ref, g_ref, be_ref, w1_ref, w2_ref,
                  o_ref, shift_ref, conv_ref):
    # x: (1,T,E) bf16 | wqkv: (E,3E) | bqkv/cb: (1,3E) | cw: (3,3E)
    # cos/sin: (T,D/2) f32 | wo: (E,E) | bo/g/be: (1,E) | w1: (E,HID) | w2: (HID,E)
    # o: (1,T,E) | scratch: shift (T+2,3E) f32, conv (T,3E) f32
    f32 = jnp.float32
    bf16 = jnp.bfloat16
    T, E = x_ref.shape[1], x_ref.shape[2]
    D2 = cos_ref.shape[1]
    D = 2 * D2
    H = E // D
    C3 = 3 * E

    # ---- 1) QKV projection: bf16 operands on the MXU, f32 accumulation ----
    qkv = jnp.dot(x_ref[0], wqkv_ref[...], preferred_element_type=f32)      # (T, 3E)
    qkv = qkv + bqkv_ref[...].astype(f32)

    # ---- 2) causal depthwise conv k=3 (pad=2, trim 2): shifts via zero-padded scratch ----
    shift_ref[0:2, :] = jnp.zeros((2, C3), f32)
    shift_ref[2:T + 2, :] = qkv
    q1 = shift_ref[1:T + 1, :]                                              # qkv[t-1], 0-padded
    q2 = shift_ref[0:T, :]                                                  # qkv[t-2], 0-padded
    c0 = cw_ref[0:1, :].astype(f32)
    c1 = cw_ref[1:2, :].astype(f32)
    c2 = cw_ref[2:3, :].astype(f32)
    conv_ref[...] = q2 * c0 + q1 * c1 + qkv * c2 + cb_ref[...].astype(f32)  # (T, 3E) f32

    # ---- 3) per-head rotary + non-causal softmax attention + fused out_proj ----
    cosf = cos_ref[...]                                                     # (T, D2) f32
    sinf = sin_ref[...]                                                     # (T, D2) f32
    scale = 1.0 / math.sqrt(D)
    dn = (((1,), (1,)), ((), ()))                                           # contract last dims

    y = jnp.zeros((T, E), f32)                                              # out_proj accumulator
    for h in range(H):                                                      # H=4, unrolled
        q_lo = conv_ref[:, h * D: h * D + D2]
        q_hi = conv_ref[:, h * D + D2: (h + 1) * D]
        k_lo = conv_ref[:, E + h * D: E + h * D + D2]
        k_hi = conv_ref[:, E + h * D + D2: E + (h + 1) * D]
        vh = conv_ref[:, 2 * E + h * D: 2 * E + (h + 1) * D]

        # GPT-NeoX (non-interleaved) rotary on lo/hi half channels, pure VPU.
        # The 1/sqrt(D) attention scale is folded into the rotated query.
        qr_lo = (q_lo * cosf - q_hi * sinf) * scale
        qr_hi = (q_hi * cosf + q_lo * sinf) * scale
        kr_lo = k_lo * cosf - k_hi * sinf
        kr_hi = k_hi * cosf + k_lo * sinf

        # scores = qr . kr summed over the full head dim = lo-dot + hi-dot (bf16 MXU, f32 acc)
        s = (jax.lax.dot_general(qr_lo.astype(bf16), kr_lo.astype(bf16), dn,
                                 preferred_element_type=f32)
             + jax.lax.dot_general(qr_hi.astype(bf16), kr_hi.astype(bf16), dn,
                                   preferred_element_type=f32))             # (T, T)
        m = jnp.max(s, axis=-1, keepdims=True)
        e = jnp.exp(s - m)
        p = e * pl.reciprocal(jnp.sum(e, axis=-1, keepdims=True), approx=True)
        ctx_h = jnp.dot(p.astype(bf16), vh.astype(bf16),
                        preferred_element_type=f32)                         # (T, D) f32
        # fused output projection: ctx_h @ Wo[h*D:(h+1)*D, :] accumulated in f32
        y = y + jnp.dot(ctx_h.astype(bf16), wo_ref[h * D:(h + 1) * D, :],
                        preferred_element_type=f32)                         # (T, E)

    y = y + bo_ref[...].astype(f32)

    # ---- 4) LayerNorm + GELU FFN (bf16 MXU, f32 VPU/EUP) ----
    mu = jnp.mean(y, axis=-1, keepdims=True)
    var = jnp.mean(jnp.square(y - mu), axis=-1, keepdims=True)
    yn = (y - mu) * jax.lax.rsqrt(var + 1e-5)
    yn = yn * g_ref[...].astype(f32) + be_ref[...].astype(f32)

    hmid = jnp.dot(yn.astype(bf16), w1_ref[...], preferred_element_type=f32)
    hmid = _gelu_exact(hmid)
    out = jnp.dot(hmid.astype(bf16), w2_ref[...], preferred_element_type=f32)
    o_ref[0] = out.astype(o_ref.dtype)


# --------------------------------- wrapper ------------------------------------

@functools.lru_cache(maxsize=None)
def _rope_tables(T, D):
    # built once per (T, D); base 10000, non-interleaved (half tables).
    inv_freq = 1.0 / (10000.0 ** (jnp.arange(0, D, 2, dtype=jnp.float32) / float(D)))
    freqs = jnp.outer(jnp.arange(T, dtype=jnp.float32), inv_freq)           # (T, D//2)
    return jnp.cos(freqs), jnp.sin(freqs)


def block_forward(x, p, *, n_head):
    B, T, E = x.shape
    D = E // n_head
    C3 = 3 * E
    HID = p["w1"].shape[1]
    cos_t, sin_t = _rope_tables(T, D)

    def rep(shape):  # replicated (weight / table) operand, 2-D
        return pl.BlockSpec(shape, lambda b: (0, 0))

    return pl.pallas_call(
        _block_kernel,
        out_shape=jax.ShapeDtypeStruct((B, T, E), x.dtype),
        grid=(B,),
        in_specs=[
            pl.BlockSpec((1, T, E), lambda b: (b, 0, 0)),   # x
            rep((E, C3)),                                   # wqkv
            rep((1, C3)),                                   # bqkv
            rep((3, C3)),                                   # cw
            rep((1, C3)),                                   # cb
            rep((T, D // 2)),                               # cos
            rep((T, D // 2)),                               # sin
            rep((E, E)),                                    # wo
            rep((1, E)),                                    # bo
            rep((1, E)),                                    # gamma
            rep((1, E)),                                    # beta
            rep((E, HID)),                                  # w1
            rep((HID, E)),                                  # w2
        ],
        out_specs=pl.BlockSpec((1, T, E), lambda b: (b, 0, 0)),
        scratch_shapes=[
            pltpu.VMEM((T + 2, C3), jnp.float32),           # zero-padded shift buffer
            pltpu.VMEM((T, C3), jnp.float32),               # post-conv qkv slab
        ],
        compiler_params=pltpu.CompilerParams(dimension_semantics=("parallel",)),
    )(x, p["wqkv"], p["bqkv"], p["cw"], p["cb"], cos_t, sin_t,
      p["wo"], p["bo"], p["gamma"], p["beta"], p["w1"], p["w2"])


# ------------------------------ pure-JAX reference ----------------------------

def block_reference(x, p, *, n_head):
    B, T, E = x.shape
    H = n_head
    D = E // H
    D2 = D // 2
    f32 = jnp.float32
    xf = x.astype(f32)

    qkv = xf @ p["wqkv"].astype(f32) + p["bqkv"].astype(f32)
    cw = p["cw"].astype(f32)
    cb = p["cb"].astype(f32)
    z1 = jnp.pad(qkv, ((0, 0), (1, 0), (0, 0)))[:, :T]
    z2 = jnp.pad(qkv, ((0, 0), (2, 0), (0, 0)))[:, :T]
    qkv = z2 * cw[0] + z1 * cw[1] + qkv * cw[2] + cb

    qkv5 = qkv.reshape(B, T, 3, H, D)
    q = jnp.transpose(qkv5[:, :, 0], (0, 2, 1, 3))
    k = jnp.transpose(qkv5[:, :, 1], (0, 2, 1, 3))
    v = jnp.transpose(qkv5[:, :, 2], (0, 2, 1, 3))

    inv_freq = 1.0 / (10000.0 ** (jnp.arange(0, D, 2, dtype=f32) / D))
    freqs = jnp.outer(jnp.arange(T, dtype=f32), inv_freq)
    cos, sin = jnp.cos(freqs), jnp.sin(freqs)

    def rope(t):
        t1, t2 = t[..., :D2], t[..., D2:]
        return jnp.concatenate([t1 * cos - t2 * sin, t2 * cos + t1 * sin], axis=-1)

    q, k = rope(q), rope(k)
    s = jnp.einsum('bhtd,bhsd->bhts', q, k) / jnp.sqrt(jnp.asarray(D, f32))
    a = jax.nn.softmax(s, axis=-1)
    ctx = jnp.einsum('bhts,bhsd->bhtd', a, v).transpose(0, 2, 1, 3).reshape(B, T, E)

    y = ctx @ p["wo"].astype(f32) + p["bo"].astype(f32)
    mu = y.mean(-1, keepdims=True)
    var = ((y - mu) ** 2).mean(-1, keepdims=True)
    yn = (y - mu) / jnp.sqrt(var + 1e-5) * p["gamma"].astype(f32) + p["beta"].astype(f32)
    h = jax.nn.gelu(yn @ p["w1"].astype(f32), approximate=False)
    return h @ p["w2"].astype(f32)


# ----------------------------------- main --------------------------------------

if __name__ == "__main__":
    # small config: n_embed=32, n_head=4 (head_size=8), hidden_size=128, block_size(T)=8, B=2
    B, T, E, H, HID = 2, 8, 32, 4, 128
    C3 = 3 * E
    dtype = jnp.bfloat16  # config.precision == bfloat16

    key = jax.random.PRNGKey(0)
    ks = jax.random.split(key, 10)
    params = {
        "wqkv": (jax.random.normal(ks[0], (E, C3), jnp.float32) * 0.02).astype(dtype),
        "bqkv": (jax.random.normal(ks[1], (1, C3), jnp.float32) * 0.02).astype(dtype),
        "cw":   (jax.random.normal(ks[2], (3, C3), jnp.float32) * 0.2).astype(dtype),
        "cb":   (jax.random.normal(ks[3], (1, C3), jnp.float32) * 0.02).astype(dtype),
        "wo":   (jax.random.normal(ks[4], (E, E), jnp.float32) * 0.02).astype(dtype),
        "bo":   (jax.random.normal(ks[5], (1, E), jnp.float32) * 0.02).astype(dtype),
        "gamma": jnp.ones((1, E), dtype),
        "beta":  jnp.zeros((1, E), dtype),
        "w1":   (jax.random.normal(ks[6], (E, HID), jnp.float32) * 0.02).astype(dtype),
        "w2":   (jax.random.normal(ks[7], (HID, E), jnp.float32) * 0.02).astype(dtype),
    }
    x = jax.random.normal(ks[8], (B, T, E), jnp.float32).astype(dtype)

    fwd = jax.jit(functools.partial(block_forward, n_head=H))
    out = jax.block_until_ready(fwd(x, params))

    ref = block_reference(x, params, n_head=H)
    assert out.shape == (B, T, E) and out.dtype == dtype
    assert bool(jnp.all(jnp.isfinite(out.astype(jnp.float32))))
    assert bool(jnp.allclose(out.astype(jnp.float32), ref, atol=5e-2, rtol=5e-2))

    print("KERNEL_OK")
</pallas_src>

<mosaic_0001>
module attributes {stable_mosaic.version = 11 : i64} {
  func.func @_block_kernel(%arg0: i32, %arg1: memref<1x8x32xbf16, #tpu.memory_space<vmem>>, %arg2: memref<32x96xbf16, #tpu.memory_space<vmem>>, %arg3: memref<1x96xbf16, #tpu.memory_space<vmem>>, %arg4: memref<3x96xbf16, #tpu.memory_space<vmem>>, %arg5: memref<1x96xbf16, #tpu.memory_space<vmem>>, %arg6: memref<8x4xf32, #tpu.memory_space<vmem>>, %arg7: memref<8x4xf32, #tpu.memory_space<vmem>>, %arg8: memref<32x32xbf16, #tpu.memory_space<vmem>>, %arg9: memref<1x32xbf16, #tpu.memory_space<vmem>>, %arg10: memref<1x32xbf16, #tpu.memory_space<vmem>>, %arg11: memref<1x32xbf16, #tpu.memory_space<vmem>>, %arg12: memref<32x128xbf16, #tpu.memory_space<vmem>>, %arg13: memref<128x32xbf16, #tpu.memory_space<vmem>>, %arg14: memref<1x8x32xbf16, #tpu.memory_space<vmem>>, %arg15: memref<10x96xf32, #tpu.memory_space<vmem>>, %arg16: memref<8x96xf32, #tpu.memory_space<vmem>>) attributes {dimension_semantics = [#tpu.dimension_semantics<parallel>], iteration_bounds = array<i64: 2>, scalar_prefetch = 0 : i64, scratch_operands = 2 : i64, tpu.core_type = #tpu.core_type<tc>, window_params = [{transform_indices = @transform_0, window_bounds = array<i64: 1, 8, 32>}, {pipeline_mode = #tpu.pipeline_mode<synchronous>, transform_indices = @transform_1, window_bounds = array<i64: 32, 96>}, {pipeline_mode = #tpu.pipeline_mode<synchronous>, transform_indices = @transform_2, window_bounds = array<i64: 1, 96>}, {pipeline_mode = #tpu.pipeline_mode<synchronous>, transform_indices = @transform_3, window_bounds = array<i64: 3, 96>}, {pipeline_mode = #tpu.pipeline_mode<synchronous>, transform_indices = @transform_4, window_bounds = array<i64: 1, 96>}, {pipeline_mode = #tpu.pipeline_mode<synchronous>, transform_indices = @transform_5, window_bounds = array<i64: 8, 4>}, {pipeline_mode = #tpu.pipeline_mode<synchronous>, transform_indices = @transform_6, window_bounds = array<i64: 8, 4>}, {pipeline_mode = #tpu.pipeline_mode<synchronous>, transform_indices = @transform_7, window_bounds = array<i64: 32, 32>}, {pipeline_mode = #tpu.pipeline_mode<synchronous>, transform_indices = @transform_8, window_bounds = array<i64: 1, 32>}, {pipeline_mode = #tpu.pipeline_mode<synchronous>, transform_indices = @transform_9, window_bounds = array<i64: 1, 32>}, {pipeline_mode = #tpu.pipeline_mode<synchronous>, transform_indices = @transform_10, window_bounds = array<i64: 1, 32>}, {pipeline_mode = #tpu.pipeline_mode<synchronous>, transform_indices = @transform_11, window_bounds = array<i64: 32, 128>}, {pipeline_mode = #tpu.pipeline_mode<synchronous>, transform_indices = @transform_12, window_bounds = array<i64: 128, 32>}, {transform_indices = @transform_13, window_bounds = array<i64: 1, 8, 32>}]} {
    %c0 = arith.constant 0 : index
    %c0_0 = arith.constant 0 : index
    %c0_1 = arith.constant 0 : index
    %0 = vector.load %arg1[%c0, %c0_0, %c0_1] : memref<1x8x32xbf16, #tpu.memory_space<vmem>>, vector<1x8x32xbf16>
    %1 = vector.shape_cast %0 : vector<1x8x32xbf16> to vector<8x32xbf16>
    %c0_2 = arith.constant 0 : index
    %c0_3 = arith.constant 0 : index
    %2 = vector.load %arg2[%c0_2, %c0_3] : memref<32x96xbf16, #tpu.memory_space<vmem>>, vector<32x96xbf16>
    %cst = arith.constant dense<0.000000e+00> : vector<8x96xf32>
    %3 = tpu.matmul %1, %2, %cst {dimension_numbers = #tpu.dot_dimension_numbers<[1], [0], [0], [1], [0, 0, 1, 1], [], []>} : vector<8x32xbf16>, vector<32x96xbf16>, vector<8x96xf32> -> vector<8x96xf32>
    %c0_4 = arith.constant 0 : index
    %c0_5 = arith.constant 0 : index
    %4 = vector.load %arg3[%c0_4, %c0_5] : memref<1x96xbf16, #tpu.memory_space<vmem>>, vector<1x96xbf16>
    %5 = arith.extf %4 : vector<1x96xbf16> to vector<1x96xf32>
    %6 = vector.broadcast %5 : vector<1x96xf32> to vector<8x96xf32>
    %7 = arith.addf %3, %6 : vector<8x96xf32>
    %cst_6 = arith.constant 0.000000e+00 : f32
    %8 = vector.broadcast %cst_6 : f32 to vector<2x96xf32>
    %c0_7 = arith.constant 0 : index
    %c0_8 = arith.constant 0 : index
    %9 = vector.load %arg15[%c0_7, %c0_8] : memref<10x96xf32, #tpu.memory_space<vmem>>, vector<2x96xf32>
    tpu.vector_store %arg15[%c0_7, %c0_8], %8 {strides = array<i32>} : memref<10x96xf32, #tpu.memory_space<vmem>>, vector<2x96xf32>,
    %c2 = arith.constant 2 : index
    %c0_9 = arith.constant 0 : index
    %10 = vector.load %arg15[%c2, %c0_9] : memref<10x96xf32, #tpu.memory_space<vmem>>, vector<8x96xf32>
    tpu.vector_store %arg15[%c2, %c0_9], %7 {strides = array<i32>} : memref<10x96xf32, #tpu.memory_space<vmem>>, vector<8x96xf32>,
    %c1 = arith.constant 1 : index
    %c0_10 = arith.constant 0 : index
    %11 = vector.load %arg15[%c1, %c0_10] : memref<10x96xf32, #tpu.memory_space<vmem>>, vector<8x96xf32>
    %c0_11 = arith.constant 0 : index
    %c0_12 = arith.constant 0 : index
    %12 = vector.load %arg15[%c0_11, %c0_12] : memref<10x96xf32, #tpu.memory_space<vmem>>, vector<8x96xf32>
    %c0_13 = arith.constant 0 : index
    %c0_14 = arith.constant 0 : index
    %13 = vector.load %arg4[%c0_13, %c0_14] : memref<3x96xbf16, #tpu.memory_space<vmem>>, vector<1x96xbf16>
    %14 = arith.extf %13 : vector<1x96xbf16> to vector<1x96xf32>
    %c1_15 = arith.constant 1 : index
    %c0_16 = arith.constant 0 : index
    %15 = vector.load %arg4[%c1_15, %c0_16] : memref<3x96xbf16, #tpu.memory_space<vmem>>, vector<1x96xbf16>
    %16 = arith.extf %15 : vector<1x96xbf16> to vector<1x96xf32>
    %c2_17 = arith.constant 2 : index
    %c0_18 = arith.constant 0 : index
    %17 = vector.load %arg4[%c2_17, %c0_18] : memref<3x96xbf16, #tpu.memory_space<vmem>>, vector<1x96xbf16>
    %18 = arith.extf %17 : vector<1x96xbf16> to vector<1x96xf32>
    %19 = vector.broadcast %14 : vector<1x96xf32> to vector<8x96xf32>
    %20 = arith.mulf %12, %19 : vector<8x96xf32>
    %21 = vector.broadcast %16 : vector<1x96xf32> to vector<8x96xf32>
    %22 = arith.mulf %11, %21 : vector<8x96xf32>
    %23 = arith.addf %20, %22 : vector<8x96xf32>
    %24 = vector.broadcast %18 : vector<1x96xf32> to vector<8x96xf32>
    %25 = arith.mulf %7, %24 : vector<8x96xf32>
    %26 = arith.addf %23, %25 : vector<8x96xf32>
    %c0_19 = arith.constant 0 : index
    %c0_20 = arith.constant 0 : index
    %27 = vector.load %arg5[%c0_19, %c0_20] : memref<1x96xbf16, #tpu.memory_space<vmem>>, vector<1x96xbf16>
    %28 = arith.extf %27 : vector<1x96xbf16> to vector<1x96xf32>
    %29 = vector.broadcast %28 : vector<1x96xf32> to vector<8x96xf32>
    %30 = arith.addf %26, %29 : vector<8x96xf32>
    %c0_21 = arith.constant 0 : index
    %c0_22 = arith.constant 0 : index
    %31 = vector.load %arg16[%c0_21, %c0_22] : memref<8x96xf32, #tpu.memory_space<vmem>>, vector<8x96xf32>
    tpu.vector_store %arg16[%c0_21, %c0_22], %30 {strides = array<i32>} : memref<8x96xf32, #tpu.memory_space<vmem>>, vector<8x96xf32>,
    %c0_23 = arith.constant 0 : index
    %c0_24 = arith.constant 0 : index
    %32 = vector.load %arg6[%c0_23, %c0_24] : memref<8x4xf32, #tpu.memory_space<vmem>>, vector<8x4xf32>
    %c0_25 = arith.constant 0 : index
    %c0_26 = arith.constant 0 : index
    %33 = vector.load %arg7[%c0_25, %c0_26] : memref<8x4xf32, #tpu.memory_space<vmem>>, vector<8x4xf32>
    %cst_27 = arith.constant 0.000000e+00 : f32
    %34 = vector.broadcast %cst_27 : f32 to vector<8x32xf32>
    %c0_28 = arith.constant 0 : index
    %c0_29 = arith.constant 0 : index
    %35 = vector.load %arg16[%c0_28, %c0_29] : memref<8x96xf32, #tpu.memory_space<vmem>>, vector<8x4xf32>
    %c0_30 = arith.constant 0 : index
    %c4 = arith.constant 4 : index
    %36 = vector.load %arg16[%c0_30, %c4] : memref<8x96xf32, #tpu.memory_space<vmem>>, vector<8x4xf32>
    %c0_31 = arith.constant 0 : index
    %c32 = arith.constant 32 : index
    %37 = vector.load %arg16[%c0_31, %c32] : memref<8x96xf32, #tpu.memory_space<vmem>>, vector<8x4xf32>
    %c0_32 = arith.constant 0 : index
    %c36 = arith.constant 36 : index
    %38 = vector.load %arg16[%c0_32, %c36] : memref<8x96xf32, #tpu.memory_space<vmem>>, vector<8x4xf32>
    %c0_33 = arith.constant 0 : index
    %c64 = arith.constant 64 : index
    %39 = vector.load %arg16[%c0_33, %c64] : memref<8x96xf32, #tpu.memory_space<vmem>>, vector<8x8xf32>
    %40 = arith.mulf %35, %32 : vector<8x4xf32>
    %41 = arith.mulf %36, %33 : vector<8x4xf32>
    %42 = arith.subf %40, %41 : vector<8x4xf32>
    %cst_34 = arith.constant 0.353553385 : f32
    %43 = vector.broadcast %cst_34 : f32 to vector<8x4xf32>
    %44 = arith.mulf %42, %43 : vector<8x4xf32>
    %45 = arith.mulf %36, %32 : vector<8x4xf32>
    %46 = arith.mulf %35, %33 : vector<8x4xf32>
    %47 = arith.addf %45, %46 : vector<8x4xf32>
    %cst_35 = arith.constant 0.353553385 : f32
    %48 = vector.broadcast %cst_35 : f32 to vector<8x4xf32>
    %49 = arith.mulf %47, %48 : vector<8x4xf32>
    %50 = arith.mulf %37, %32 : vector<8x4xf32>
    %51 = arith.mulf %38, %33 : vector<8x4xf32>
    %52 = arith.subf %50, %51 : vector<8x4xf32>
    %53 = arith.mulf %38, %32 : vector<8x4xf32>
    %54 = arith.mulf %37, %33 : vector<8x4xf32>
    %55 = arith.addf %53, %54 : vector<8x4xf32>
    %56 = arith.truncf %44 : vector<8x4xf32> to vector<8x4xbf16>
    %57 = arith.truncf %52 : vector<8x4xf32> to vector<8x4xbf16>
    %cst_36 = arith.constant dense<0.000000e+00> : vector<8x8xf32>
    %58 = tpu.matmul %56, %57, %cst_36 {dimension_numbers = #tpu.dot_dimension_numbers<[1], [1], [0], [0], [0, 0, 1, 0], [], []>} : vector<8x4xbf16>, vector<8x4xbf16>, vector<8x8xf32> -> vector<8x8xf32>
    %59 = arith.truncf %49 : vector<8x4xf32> to vector<8x4xbf16>
    %60 = arith.truncf %55 : vector<8x4xf32> to vector<8x4xbf16>
    %cst_37 = arith.constant dense<0.000000e+00> : vector<8x8xf32>
    %61 = tpu.matmul %59, %60, %cst_37 {dimension_numbers = #tpu.dot_dimension_numbers<[1], [1], [0], [0], [0, 0, 1, 0], [], []>} : vector<8x4xbf16>, vector<8x4xbf16>, vector<8x8xf32> -> vector<8x8xf32>
    %62 = arith.addf %58, %61 : vector<8x8xf32>
    %cst_38 = arith.constant dense<0xFF800000> : vector<8xf32>
    %63 = vector.multi_reduction <maximumf>, %62, %cst_38 [1] : vector<8x8xf32> to vector<8xf32>
    %64 = vector.shape_cast %63 : vector<8xf32> to vector<8x1xf32>
    %65 = vector.broadcast %64 : vector<8x1xf32> to vector<8x8xf32>
    %66 = arith.subf %62, %65 : vector<8x8xf32>
    %67 = math.exp %66 : vector<8x8xf32>
    %cst_39 = arith.constant dense<0.000000e+00> : vector<8xf32>
    %68 = vector.multi_reduction <add>, %67, %cst_39 [1] : vector<8x8xf32> to vector<8xf32>
    %69 = vector.shape_cast %68 : vector<8xf32> to vector<8x1xf32>
    %70 = tpu.reciprocal %69 {approx = true} : vector<8x1xf32> -> vector<8x1xf32>
    %71 = vector.broadcast %70 : vector<8x1xf32> to vector<8x8xf32>
    %72 = arith.mulf %67, %71 : vector<8x8xf32>
    %73 = arith.truncf %72 : vector<8x8xf32> to vector<8x8xbf16>
    %74 = arith.truncf %39 : vector<8x8xf32> to vector<8x8xbf16>
    %cst_40 = arith.constant dense<0.000000e+00> : vector<8x8xf32>
    %75 = tpu.matmul %73, %74, %cst_40 {dimension_numbers = #tpu.dot_dimension_numbers<[1], [0], [0], [1], [0, 0, 1, 1], [], []>} : vector<8x8xbf16>, vector<8x8xbf16>, vector<8x8xf32> -> vector<8x8xf32>
    %76 = arith.truncf %75 : vector<8x8xf32> to vector<8x8xbf16>
    %c0_41 = arith.constant 0 : index
    %c0_42 = arith.constant 0 : index
    %77 = vector.load %arg8[%c0_41, %c0_42] : memref<32x32xbf16, #tpu.memory_space<vmem>>, vector<8x32xbf16>
    %cst_43 = arith.constant dense<0.000000e+00> : vector<8x32xf32>
    %78 = tpu.matmul %76, %77, %cst_43 {dimension_numbers = #tpu.dot_dimension_numbers<[1], [0], [0], [1], [0, 0, 1, 1], [], []>} : vector<8x8xbf16>, vector<8x32xbf16>, vector<8x32xf32> -> vector<8x32xf32>
    %79 = arith.addf %34, %78 : vector<8x32xf32>
    %c0_44 = arith.constant 0 : index
    %c8 = arith.constant 8 : index
    %80 = vector.load %arg16[%c0_44, %c8] : memref<8x96xf32, #tpu.memory_space<vmem>>, vector<8x4xf32>
    %c0_45 = arith.constant 0 : index
    %c12 = arith.constant 12 : index
    %81 = vector.load %arg16[%c0_45, %c12] : memref<8x96xf32, #tpu.memory_space<vmem>>, vector<8x4xf32>
    %c0_46 = arith.constant 0 : index
    %c40 = arith.constant 40 : index
    %82 = vector.load %arg16[%c0_46, %c40] : memref<8x96xf32, #tpu.memory_space<vmem>>, vector<8x4xf32>
    %c0_47 = arith.constant 0 : index
    %c44 = arith.constant 44 : index
    %83 = vector.load %arg16[%c0_47, %c44] : memref<8x96xf32, #tpu.memory_space<vmem>>, vector<8x4xf32>
    %c0_48 = arith.constant 0 : index
    %c72 = arith.constant 72 : index
    %84 = vector.load %arg16[%c0_48, %c72] : memref<8x96xf32, #tpu.memory_space<vmem>>, vector<8x8xf32>
    %85 = arith.mulf %80, %32 : vector<8x4xf32>
    %86 = arith.mulf %81, %33 : vector<8x4xf32>
    %87 = arith.subf %85, %86 : vector<8x4xf32>
    %cst_49 = arith.constant 0.353553385 : f32
    %88 = vector.broadcast %cst_49 : f32 to vector<8x4xf32>
    %89 = arith.mulf %87, %88 : vector<8x4xf32>
    %90 = arith.mulf %81, %32 : vector<8x4xf32>
    %91 = arith.mulf %80, %33 : vector<8x4xf32>
    %92 = arith.addf %90, %91 : vector<8x4xf32>
    %cst_50 = arith.constant 0.353553385 : f32
    %93 = vector.broadcast %cst_50 : f32 to vector<8x4xf32>
    %94 = arith.mulf %92, %93 : vector<8x4xf32>
    %95 = arith.mulf %82, %32 : vector<8x4xf32>
    %96 = arith.mulf %83, %33 : vector<8x4xf32>
    %97 = arith.subf %95, %96 : vector<8x4xf32>
    %98 = arith.mulf %83, %32 : vector<8x4xf32>
    %99 = arith.mulf %82, %33 : vector<8x4xf32>
    %100 = arith.addf %98, %99 : vector<8x4xf32>
    %101 = arith.truncf %89 : vector<8x4xf32> to vector<8x4xbf16>
    %102 = arith.truncf %97 : vector<8x4xf32> to vector<8x4xbf16>
    %cst_51 = arith.constant dense<0.000000e+00> : vector<8x8xf32>
    %103 = tpu.matmul %101, %102, %cst_51 {dimension_numbers = #tpu.dot_dimension_numbers<[1], [1], [0], [0], [0, 0, 1, 0], [], []>} : vector<8x4xbf16>, vector<8x4xbf16>, vector<8x8xf32> -> vector<8x8xf32>
    %104 = arith.truncf %94 : vector<8x4xf32> to vector<8x4xbf16>
    %105 = arith.truncf %100 : vector<8x4xf32> to vector<8x4xbf16>
    %cst_52 = arith.constant dense<0.000000e+00> : vector<8x8xf32>
    %106 = tpu.matmul %104, %105, %cst_52 {dimension_numbers = #tpu.dot_dimension_numbers<[1], [1], [0], [0], [0, 0, 1, 0], [], []>} : vector<8x4xbf16>, vector<8x4xbf16>, vector<8x8xf32> -> vector<8x8xf32>
    %107 = arith.addf %103, %106 : vector<8x8xf32>
    %cst_53 = arith.constant dense<0xFF800000> : vector<8xf32>
    %108 = vector.multi_reduction <maximumf>, %107, %cst_53 [1] : vector<8x8xf32> to vector<8xf32>
    %109 = vector.shape_cast %108 : vector<8xf32> to vector<8x1xf32>
    %110 = vector.broadcast %109 : vector<8x1xf32> to vector<8x8xf32>
    %111 = arith.subf %107, %110 : vector<8x8xf32>
    %112 = math.exp %111 : vector<8x8xf32>
    %cst_54 = arith.constant dense<0.000000e+00> : vector<8xf32>
    %113 = vector.multi_reduction <add>, %112, %cst_54 [1] : vector<8x8xf32> to vector<8xf32>
    %114 = vector.shape_cast %113 : vector<8xf32> to vector<8x1xf32>
    %115 = tpu.reciprocal %114 {approx = true} : vector<8x1xf32> -> vector<8x1xf32>
    %116 = vector.broadcast %115 : vector<8x1xf32> to vector<8x8xf32>
    %117 = arith.mulf %112, %116 : vector<8x8xf32>
    %118 = arith.truncf %117 : vector<8x8xf32> to vector<8x8xbf16>
    %119 = arith.truncf %84 : vector<8x8xf32> to vector<8x8xbf16>
    %cst_55 = arith.constant dense<0.000000e+00> : vector<8x8xf32>
    %120 = tpu.matmul %118, %119, %cst_55 {dimension_numbers = #tpu.dot_dimension_numbers<[1], [0], [0], [1], [0, 0, 1, 1], [], []>} : vector<8x8xbf16>, vector<8x8xbf16>, vector<8x8xf32> -> vector<8x8xf32>
    %121 = arith.truncf %120 : vector<8x8xf32> to vector<8x8xbf16>
    %c8_56 = arith.constant 8 : index
    %c0_57 = arith.constant 0 : index
    %122 = vector.load %arg8[%c8_56, %c0_57] : memref<32x32xbf16, #tpu.memory_space<vmem>>, vector<8x32xbf16>
    %cst_58 = arith.constant dense<0.000000e+00> : vector<8x32xf32>
    %123 = tpu.matmul %121, %122, %cst_58 {dimension_numbers = #tpu.dot_dimension_numbers<[1], [0], [0], [1], [0, 0, 1, 1], [], []>} : vector<8x8xbf16>, vector<8x32xbf16>, vector<8x32xf32> -> vector<8x32xf32>
    %124 = arith.addf %79, %123 : vector<8x32xf32>
    %c0_59 = arith.constant 0 : index
    %c16 = arith.constant 16 : index
    %125 = vector.load %arg16[%c0_59, %c16] : memref<8x96xf32, #tpu.memory_space<vmem>>, vector<8x4xf32>
    %c0_60 = arith.constant 0 : index
    %c20 = arith.constant 20 : index
    %126 = vector.load %arg16[%c0_60, %c20] : memref<8x96xf32, #tpu.memory_space<vmem>>, vector<8x4xf32>
    %c0_61 = arith.constant 0 : index
    %c48 = arith.constant 48 : index
    %127 = vector.load %arg16[%c0_61, %c48] : memref<8x96xf32, #tpu.memory_space<vmem>>, vector<8x4xf32>
    %c0_62 = arith.constant 0 : index
    %c52 = arith.constant 52 : index
    %128 = vector.load %arg16[%c0_62, %c52] : memref<8x96xf32, #tpu.memory_space<vmem>>, vector<8x4xf32>
    %c0_63 = arith.constant 0 : index
    %c80 = arith.constant 80 : index
    %129 = vector.load %arg16[%c0_63, %c80] : memref<8x96xf32, #tpu.memory_space<vmem>>, vector<8x8xf32>
    %130 = arith.mulf %125, %32 : vector<8x4xf32>
    %131 = arith.mulf %126, %33 : vector<8x4xf32>
    %132 = arith.subf %130, %131 : vector<8x4xf32>
    %cst_64 = arith.constant 0.353553385 : f32
    %133 = vector.broadcast %cst_64 : f32 to vector<8x4xf32>
    %134 = arith.mulf %132, %133 : vector<8x4xf32>
    %135 = arith.mulf %126, %32 : vector<8x4xf32>
    %136 = arith.mulf %125, %33 : vector<8x4xf32>
    %137 = arith.addf %135, %136 : vector<8x4xf32>
    %cst_65 = arith.constant 0.353553385 : f32
    %138 = vector.broadcast %cst_65 : f32 to vector<8x4xf32>
    %139 = arith.mulf %137, %138 : vector<8x4xf32>
    %140 = arith.mulf %127, %32 : vector<8x4xf32>
    %141 = arith.mulf %128, %33 : vector<8x4xf32>
    %142 = arith.subf %140, %141 : vector<8x4xf32>
    %143 = arith.mulf %128, %32 : vector<8x4xf32>
    %144 = arith.mulf %127, %33 : vector<8x4xf32>
    %145 = arith.addf %143, %144 : vector<8x4xf32>
    %146 = arith.truncf %134 : vector<8x4xf32> to vector<8x4xbf16>
    %147 = arith.truncf %142 : vector<8x4xf32> to vector<8x4xbf16>
    %cst_66 = arith.constant dense<0.000000e+00> : vector<8x8xf32>
    %148 = tpu.matmul %146, %147, %cst_66 {dimension_numbers = #tpu.dot_dimension_numbers<[1], [1], [0], [0], [0, 0, 1, 0], [], []>} : vector<8x4xbf16>, vector<8x4xbf16>, vector<8x8xf32> -> vector<8x8xf32>
    %149 = arith.truncf %139 : vector<8x4xf32> to vector<8x4xbf16>
    %150 = arith.truncf %145 : vector<8x4xf32> to vector<8x4xbf16>
    %cst_67 = arith.constant dense<0.000000e+00> : vector<8x8xf32>
    %151 = tpu.matmul %149, %150, %cst_67 {dimension_numbers = #tpu.dot_dimension_numbers<[1], [1], [0], [0], [0, 0, 1, 0], [], []>} : vector<8x4xbf16>, vector<8x4xbf16>, vector<8x8xf32> -> vector<8x8xf32>
    %152 = arith.addf %148, %151 : vector<8x8xf32>
    %cst_68 = arith.constant dense<0xFF800000> : vector<8xf32>
    %153 = vector.multi_reduction <maximumf>, %152, %cst_68 [1] : vector<8x8xf32> to vector<8xf32>
    %154 = vector.shape_cast %153 : vector<8xf32> to vector<8x1xf32>
    %155 = vector.broadcast %154 : vector<8x1xf32> to vector<8x8xf32>
    %156 = arith.subf %152, %155 : vector<8x8xf32>
    %157 = math.exp %156 : vector<8x8xf32>
    %cst_69 = arith.constant dense<0.000000e+00> : vector<8xf32>
    %158 = vector.multi_reduction <add>, %157, %cst_69 [1] : vector<8x8xf32> to vector<8xf32>
    %159 = vector.shape_cast %158 : vector<8xf32> to vector<8x1xf32>
    %160 = tpu.reciprocal %159 {approx = true} : vector<8x1xf32> -> vector<8x1xf32>
    %161 = vector.broadcast %160 : vector<8x1xf32> to vector<8x8xf32>
    %162 = arith.mulf %157, %161 : vector<8x8xf32>
    %163 = arith.truncf %162 : vector<8x8xf32> to vector<8x8xbf16>
    %164 = arith.truncf %129 : vector<8x8xf32> to vector<8x8xbf16>
    %cst_70 = arith.constant dense<0.000000e+00> : vector<8x8xf32>
    %165 = tpu.matmul %163, %164, %cst_70 {dimension_numbers = #tpu.dot_dimension_numbers<[1], [0], [0], [1], [0, 0, 1, 1], [], []>} : vector<8x8xbf16>, vector<8x8xbf16>, vector<8x8xf32> -> vector<8x8xf32>
    %166 = arith.truncf %165 : vector<8x8xf32> to vector<8x8xbf16>
    %c16_71 = arith.constant 16 : index
    %c0_72 = arith.constant 0 : index
    %167 = vector.load %arg8[%c16_71, %c0_72] : memref<32x32xbf16, #tpu.memory_space<vmem>>, vector<8x32xbf16>
    %cst_73 = arith.constant dense<0.000000e+00> : vector<8x32xf32>
    %168 = tpu.matmul %166, %167, %cst_73 {dimension_numbers = #tpu.dot_dimension_numbers<[1], [0], [0], [1], [0, 0, 1, 1], [], []>} : vector<8x8xbf16>, vector<8x32xbf16>, vector<8x32xf32> -> vector<8x32xf32>
    %169 = arith.addf %124, %168 : vector<8x32xf32>
    %c0_74 = arith.constant 0 : index
    %c24 = arith.constant 24 : index
    %170 = vector.load %arg16[%c0_74, %c24] : memref<8x96xf32, #tpu.memory_space<vmem>>, vector<8x4xf32>
    %c0_75 = arith.constant 0 : index
    %c28 = arith.constant 28 : index
    %171 = vector.load %arg16[%c0_75, %c28] : memref<8x96xf32, #tpu.memory_space<vmem>>, vector<8x4xf32>
    %c0_76 = arith.constant 0 : index
    %c56 = arith.constant 56 : index
    %172 = vector.load %arg16[%c0_76, %c56] : memref<8x96xf32, #tpu.memory_space<vmem>>, vector<8x4xf32>
    %c0_77 = arith.constant 0 : index
    %c60 = arith.constant 60 : index
    %173 = vector.load %arg16[%c0_77, %c60] : memref<8x96xf32, #tpu.memory_space<vmem>>, vector<8x4xf32>
    %c0_78 = arith.constant 0 : index
    %c88 = arith.constant 88 : index
    %174 = vector.load %arg16[%c0_78, %c88] : memref<8x96xf32, #tpu.memory_space<vmem>>, vector<8x8xf32>
    %175 = arith.mulf %170, %32 : vector<8x4xf32>
    %176 = arith.mulf %171, %33 : vector<8x4xf32>
    %177 = arith.subf %175, %176 : vector<8x4xf32>
    %cst_79 = arith.constant 0.353553385 : f32
    %178 = vector.broadcast %cst_79 : f32 to vector<8x4xf32>
    %179 = arith.mulf %177, %178 : vector<8x4xf32>
    %180 = arith.mulf %171, %32 : vector<8x4xf32>
    %181 = arith.mulf %170, %33 : vector<8x4xf32>
    %182 = arith.addf %180, %181 : vector<8x4xf32>
    %cst_80 = arith.constant 0.353553385 : f32
    %183 = vector.broadcast %cst_80 : f32 to vector<8x4xf32>
    %184 = arith.mulf %182, %183 : vector<8x4xf32>
    %185 = arith.mulf %172, %32 : vector<8x4xf32>
    %186 = arith.mulf %173, %33 : vector<8x4xf32>
    %187 = arith.subf %185, %186 : vector<8x4xf32>
    %188 = arith.mulf %173, %32 : vector<8x4xf32>
    %189 = arith.mulf %172, %33 : vector<8x4xf32>
    %190 = arith.addf %188, %189 : vector<8x4xf32>
    %191 = arith.truncf %179 : vector<8x4xf32> to vector<8x4xbf16>
    %192 = arith.truncf %187 : vector<8x4xf32> to vector<8x4xbf16>
    %cst_81 = arith.constant dense<0.000000e+00> : vector<8x8xf32>
    %193 = tpu.matmul %191, %192, %cst_81 {dimension_numbers = #tpu.dot_dimension_numbers<[1], [1], [0], [0], [0, 0, 1, 0], [], []>} : vector<8x4xbf16>, vector<8x4xbf16>, vector<8x8xf32> -> vector<8x8xf32>
    %194 = arith.truncf %184 : vector<8x4xf32> to vector<8x4xbf16>
    %195 = arith.truncf %190 : vector<8x4xf32> to vector<8x4xbf16>
    %cst_82 = arith.constant dense<0.000000e+00> : vector<8x8xf32>
    %196 = tpu.matmul %194, %195, %cst_82 {dimension_numbers = #tpu.dot_dimension_numbers<[1], [1], [0], [0], [0, 0, 1, 0], [], []>} : vector<8x4xbf16>, vector<8x4xbf16>, vector<8x8xf32> -> vector<8x8xf32>
    %197 = arith.addf %193, %196 : vector<8x8xf32>
    %cst_83 = arith.constant dense<0xFF800000> : vector<8xf32>
    %198 = vector.multi_reduction <maximumf>, %197, %cst_83 [1] : vector<8x8xf32> to vector<8xf32>
    %199 = vector.shape_cast %198 : vector<8xf32> to vector<8x1xf32>
    %200 = vector.broadcast %199 : vector<8x1xf32> to vector<8x8xf32>
    %201 = arith.subf %197, %200 : vector<8x8xf32>
    %202 = math.exp %201 : vector<8x8xf32>
    %cst_84 = arith.constant dense<0.000000e+00> : vector<8xf32>
    %203 = vector.multi_reduction <add>, %202, %cst_84 [1] : vector<8x8xf32> to vector<8xf32>
    %204 = vector.shape_cast %203 : vector<8xf32> to vector<8x1xf32>
    %205 = tpu.reciprocal %204 {approx = true} : vector<8x1xf32> -> vector<8x1xf32>
    %206 = vector.broadcast %205 : vector<8x1xf32> to vector<8x8xf32>
    %207 = arith.mulf %202, %206 : vector<8x8xf32>
    %208 = arith.truncf %207 : vector<8x8xf32> to vector<8x8xbf16>
    %209 = arith.truncf %174 : vector<8x8xf32> to vector<8x8xbf16>
    %cst_85 = arith.constant dense<0.000000e+00> : vector<8x8xf32>
    %210 = tpu.matmul %208, %209, %cst_85 {dimension_numbers = #tpu.dot_dimension_numbers<[1], [0], [0], [1], [0, 0, 1, 1], [], []>} : vector<8x8xbf16>, vector<8x8xbf16>, vector<8x8xf32> -> vector<8x8xf32>
    %211 = arith.truncf %210 : vector<8x8xf32> to vector<8x8xbf16>
    %c24_86 = arith.constant 24 : index
    %c0_87 = arith.constant 0 : index
    %212 = vector.load %arg8[%c24_86, %c0_87] : memref<32x32xbf16, #tpu.memory_space<vmem>>, vector<8x32xbf16>
    %cst_88 = arith.constant dense<0.000000e+00> : vector<8x32xf32>
    %213 = tpu.matmul %211, %212, %cst_88 {dimension_numbers = #tpu.dot_dimension_numbers<[1], [0], [0], [1], [0, 0, 1, 1], [], []>} : vector<8x8xbf16>, vector<8x32xbf16>, vector<8x32xf32> -> vector<8x32xf32>
    %214 = arith.addf %169, %213 : vector<8x32xf32>
    %c0_89 = arith.constant 0 : index
    %c0_90 = arith.constant 0 : index
    %215 = vector.load %arg9[%c0_89, %c0_90] : memref<1x32xbf16, #tpu.memory_space<vmem>>, vector<1x32xbf16>
    %216 = arith.extf %215 : vector<1x32xbf16> to vector<1x32xf32>
    %217 = vector.broadcast %216 : vector<1x32xf32> to vector<8x32xf32>
    %218 = arith.addf %214, %217 : vector<8x32xf32>
    %cst_91 = arith.constant dense<0.000000e+00> : vector<8xf32>
    %219 = vector.multi_reduction <add>, %218, %cst_91 [1] : vector<8x32xf32> to vector<8xf32>
    %220 = vector.shape_cast %219 : vector<8xf32> to vector<8x1xf32>
    %cst_92 = arith.constant 3.200000e+01 : f32
    %221 = vector.broadcast %cst_92 : f32 to vector<8x1xf32>
    %222 = arith.divf %220, %221 : vector<8x1xf32>
    %223 = vector.broadcast %222 : vector<8x1xf32> to vector<8x32xf32>
    %224 = arith.subf %218, %223 : vector<8x32xf32>
    %225 = arith.mulf %224, %224 : vector<8x32xf32>
    %cst_93 = arith.constant dense<0.000000e+00> : vector<8xf32>
    %226 = vector.multi_reduction <add>, %225, %cst_93 [1] : vector<8x32xf32> to vector<8xf32>
    %227 = vector.shape_cast %226 : vector<8xf32> to vector<8x1xf32>
    %cst_94 = arith.constant 3.200000e+01 : f32
    %228 = vector.broadcast %cst_94 : f32 to vector<8x1xf32>
    %229 = arith.divf %227, %228 : vector<8x1xf32>
    %230 = vector.broadcast %222 : vector<8x1xf32> to vector<8x32xf32>
    %231 = arith.subf %218, %230 : vector<8x32xf32>
    %cst_95 = arith.constant 9.99999974E-6 : f32
    %232 = vector.broadcast %cst_95 : f32 to vector<8x1xf32>
    %233 = arith.addf %229, %232 : vector<8x1xf32>
    %234 = math.rsqrt %233 : vector<8x1xf32>
    %235 = vector.broadcast %234 : vector<8x1xf32> to vector<8x32xf32>
    %236 = arith.mulf %231, %235 : vector<8x32xf32>
    %c0_96 = arith.constant 0 : index
    %c0_97 = arith.constant 0 : index
    %237 = vector.load %arg10[%c0_96, %c0_97] : memref<1x32xbf16, #tpu.memory_space<vmem>>, vector<1x32xbf16>
    %238 = arith.extf %237 : vector<1x32xbf16> to vector<1x32xf32>
    %239 = vector.broadcast %238 : vector<1x32xf32> to vector<8x32xf32>
    %240 = arith.mulf %236, %239 : vector<8x32xf32>
    %c0_98 = arith.constant 0 : index
    %c0_99 = arith.constant 0 : index
    %241 = vector.load %arg11[%c0_98, %c0_99] : memref<1x32xbf16, #tpu.memory_space<vmem>>, vector<1x32xbf16>
    %242 = arith.extf %241 : vector<1x32xbf16> to vector<1x32xf32>
    %243 = vector.broadcast %242 : vector<1x32xf32> to vector<8x32xf32>
    %244 = arith.addf %240, %243 : vector<8x32xf32>
    %245 = arith.truncf %244 : vector<8x32xf32> to vector<8x32xbf16>
    %c0_100 = arith.constant 0 : index
    %c0_101 = arith.constant 0 : index
    %246 = vector.load %arg12[%c0_100, %c0_101] : memref<32x128xbf16, #tpu.memory_space<vmem>>, vector<32x128xbf16>
    %cst_102 = arith.constant dense<0.000000e+00> : vector<8x128xf32>
    %247 = tpu.matmul %245, %246, %cst_102 {dimension_numbers = #tpu.dot_dimension_numbers<[1], [0], [0], [1], [0, 0, 1, 1], [], []>} : vector<8x32xbf16>, vector<32x128xbf16>, vector<8x128xf32> -> vector<8x128xf32>
    %cst_103 = arith.constant 5.000000e-01 : f32
    %248 = vector.broadcast %cst_103 : f32 to vector<8x128xf32>
    %249 = arith.mulf %248, %247 : vector<8x128xf32>
    %cst_104 = arith.constant 0.707106769 : f32
    %250 = vector.broadcast %cst_104 : f32 to vector<8x128xf32>
    %251 = arith.mulf %247, %250 : vector<8x128xf32>
    %cst_105 = arith.constant 0.000000e+00 : f32
    %252 = vector.broadcast %cst_105 : f32 to vector<8x128xf32>
    %253 = arith.cmpf oge, %251, %252 : vector<8x128xf32>
    %cst_106 = arith.constant 1.000000e+00 : f32
    %cst_107 = arith.constant -1.000000e+00 : f32
    %254 = vector.broadcast %cst_106 : f32 to vector<8x128xf32>
    %255 = vector.broadcast %cst_107 : f32 to vector<8x128xf32>
    %256 = arith.select %253, %254, %255 : vector<8x128xi1>, vector<8x128xf32>
    %257 = math.absf %251 : vector<8x128xf32>
    %cst_108 = arith.constant 0.327591091 : f32
    %258 = vector.broadcast %cst_108 : f32 to vector<8x128xf32>
    %259 = arith.mulf %258, %257 : vector<8x128xf32>
    %cst_109 = arith.constant 1.000000e+00 : f32
    %260 = vector.broadcast %cst_109 : f32 to vector<8x128xf32>
    %261 = arith.addf %260, %259 : vector<8x128xf32>
    %cst_110 = arith.constant 1.000000e+00 : f32
    %262 = vector.broadcast %cst_110 : f32 to vector<8x128xf32>
    %263 = arith.divf %262, %261 : vector<8x128xf32>
    %cst_111 = arith.constant 1.06140542 : f32
    %264 = vector.broadcast %cst_111 : f32 to vector<8x128xf32>
    %265 = arith.mulf %263, %264 : vector<8x128xf32>
    %cst_112 = arith.constant -1.45315206 : f32
    %266 = vector.broadcast %cst_112 : f32 to vector<8x128xf32>
    %267 = arith.addf %266, %265 : vector<8x128xf32>
    %268 = arith.mulf %263, %267 : vector<8x128xf32>
    %cst_113 = arith.constant 1.42141378 : f32
    %269 = vector.broadcast %cst_113 : f32 to vector<8x128xf32>
    %270 = arith.addf %269, %268 : vector<8x128xf32>
    %271 = arith.mulf %263, %270 : vector<8x128xf32>
    %cst_114 = arith.constant -0.284496725 : f32
    %272 = vector.broadcast %cst_114 : f32 to vector<8x128xf32>
    %273 = arith.addf %272, %271 : vector<8x128xf32>
    %274 = arith.mulf %263, %273 : vector<8x128xf32>
    %cst_115 = arith.constant 0.254829586 : f32
    %275 = vector.broadcast %cst_115 : f32 to vector<8x128xf32>
    %276 = arith.addf %275, %274 : vector<8x128xf32>
    %277 = arith.mulf %263, %276 : vector<8x128xf32>
    %cst_116 = arith.constant 0.000000e+00 : f32
    %278 = vector.broadcast %cst_116 : f32 to vector<8x128xf32>
    %279 = arith.subf %278, %257 : vector<8x128xf32>
    %280 = arith.mulf %279, %257 : vector<8x128xf32>
    %281 = math.exp %280 : vector<8x128xf32>
    %282 = arith.mulf %277, %281 : vector<8x128xf32>
    %cst_117 = arith.constant 1.000000e+00 : f32
    %283 = vector.broadcast %cst_117 : f32 to vector<8x128xf32>
    %284 = arith.subf %283, %282 : vector<8x128xf32>
    %285 = arith.mulf %256, %284 : vector<8x128xf32>
    %cst_118 = arith.constant 1.000000e+00 : f32
    %286 = vector.broadcast %cst_118 : f32 to vector<8x128xf32>
    %287 = arith.addf %286, %285 : vector<8x128xf32>
    %288 = arith.mulf %249, %287 : vector<8x128xf32>
    %289 = arith.truncf %288 : vector<8x128xf32> to vector<8x128xbf16>
    %c0_119 = arith.constant 0 : index
    %c0_120 = arith.constant 0 : index
    %290 = vector.load %arg13[%c0_119, %c0_120] : memref<128x32xbf16, #tpu.memory_space<vmem>>, vector<128x32xbf16>
    %cst_121 = arith.constant dense<0.000000e+00> : vector<8x32xf32>
    %291 = tpu.matmul %289, %290, %cst_121 {dimension_numbers = #tpu.dot_dimension_numbers<[1], [0], [0], [1], [0, 0, 1, 1], [], []>} : vector<8x128xbf16>, vector<128x32xbf16>, vector<8x32xf32> -> vector<8x32xf32>
    %292 = arith.truncf %291 : vector<8x32xf32> to vector<8x32xbf16>
    %c0_122 = arith.constant 0 : index
    %c0_123 = arith.constant 0 : index
    %c0_124 = arith.constant 0 : index
    %293 = vector.load %arg14[%c0_122, %c0_123, %c0_124] : memref<1x8x32xbf16, #tpu.memory_space<vmem>>, vector<1x8x32xbf16>
    %294 = vector.shape_cast %293 : vector<1x8x32xbf16> to vector<8x32xbf16>
    %295 = vector.shape_cast %292 : vector<8x32xbf16> to vector<1x8x32xbf16>
    tpu.vector_store %arg14[%c0_122, %c0_123, %c0_124], %295 {strides = array<i32>} : memref<1x8x32xbf16, #tpu.memory_space<vmem>>, vector<1x8x32xbf16>,
    return
  }
  func.func @transform_0(%arg0: i32) -> (i32, i32, i32) {
    %c0_i32 = arith.constant 0 : i32
    %c0_i32_0 = arith.constant 0 : i32
    %c0_i32_1 = arith.constant 0 : i32
    return %arg0, %c0_i32, %c0_i32_0 : i32, i32, i32
  }
  func.func @transform_1(%arg0: i32) -> (i32, i32) {
    %c0_i32 = arith.constant 0 : i32
    %c0_i32_0 = arith.constant 0 : i32
    %c0_i32_1 = arith.constant 0 : i32
    return %c0_i32, %c0_i32_0 : i32, i32
  }
  func.func @transform_2(%arg0: i32) -> (i32, i32) {
    %c0_i32 = arith.constant 0 : i32
    %c0_i32_0 = arith.constant 0 : i32
    %c0_i32_1 = arith.constant 0 : i32
    return %c0_i32, %c0_i32_0 : i32, i32
  }
  func.func @transform_3(%arg0: i32) -> (i32, i32) {
    %c0_i32 = arith.constant 0 : i32
    %c0_i32_0 = arith.constant 0 : i32
    %c0_i32_1 = arith.constant 0 : i32
    return %c0_i32, %c0_i32_0 : i32, i32
  }
  func.func @transform_4(%arg0: i32) -> (i32, i32) {
    %c0_i32 = arith.constant 0 : i32
    %c0_i32_0 = arith.constant 0 : i32
    %c0_i32_1 = arith.constant 0 : i32
    return %c0_i32, %c0_i32_0 : i32, i32
  }
  func.func @transform_5(%arg0: i32) -> (i32, i32) {
    %c0_i32 = arith.constant 0 : i32
    %c0_i32_0 = arith.constant 0 : i32
    %c0_i32_1 = arith.constant 0 : i32
    return %c0_i32, %c0_i32_0 : i32, i32
  }
  func.func @transform_6(%arg0: i32) -> (i32, i32) {
    %c0_i32 = arith.constant 0 : i32
    %c0_i32_0 = arith.constant 0 : i32
    %c0_i32_1 = arith.constant 0 : i32
    return %c0_i32, %c0_i32_0 : i32, i32
  }
  func.func @transform_7(%arg0: i32) -> (i32, i32) {
    %c0_i32 = arith.constant 0 : i32
    %c0_i32_0 = arith.constant 0 : i32
    %c0_i32_1 = arith.constant 0 : i32
    return %c0_i32, %c0_i32_0 : i32, i32
  }
  func.func @transform_8(%arg0: i32) -> (i32, i32) {
    %c0_i32 = arith.constant 0 : i32
    %c0_i32_0 = arith.constant 0 : i32
    %c0_i32_1 = arith.constant 0 : i32
    return %c0_i32, %c0_i32_0 : i32, i32
  }
  func.func @transform_9(%arg0: i32) -> (i32, i32) {
    %c0_i32 = arith.constant 0 : i32
    %c0_i32_0 = arith.constant 0 : i32
    %c0_i32_1 = arith.constant 0 : i32
    return %c0_i32, %c0_i32_0 : i32, i32
  }
  func.func @transform_10(%arg0: i32) -> (i32, i32) {
    %c0_i32 = arith.constant 0 : i32
    %c0_i32_0 = arith.constant 0 : i32
    %c0_i32_1 = arith.constant 0 : i32
    return %c0_i32, %c0_i32_0 : i32, i32
  }
  func.func @transform_11(%arg0: i32) -> (i32, i32) {
    %c0_i32 = arith.constant 0 : i32
    %c0_i32_0 = arith.constant 0 : i32
    %c0_i32_1 = arith.constant 0 : i32
    return %c0_i32, %c0_i32_0 : i32, i32
  }
  func.func @transform_12(%arg0: i32) -> (i32, i32) {
    %c0_i32 = arith.constant 0 : i32
    %c0_i32_0 = arith.constant 0 : i32
    %c0_i32_1 = arith.constant 0 : i32
    return %c0_i32, %c0_i32_0 : i32, i32
  }
  func.func @transform_13(%arg0: i32) -> (i32, i32, i32) {
    %c0_i32 = arith.constant 0 : i32
    %c0_i32_0 = arith.constant 0 : i32
    %c0_i32_1 = arith.constant 0 : i32
    return %arg0, %c0_i32, %c0_i32_0 : i32, i32, i32
  }
}

</mosaic_0001>

<bundles_post_ra>
// kernel: block_forward.1
= control target key start
LH: loop header
LB: loop body
LE: loop exit
PB: predicated region body
PF: predicated region fallthrough
CT: control target
= control target key end

     0   :  { %s2843_s0 = inlined_call_operand.vmem [shape: bf16[2,8,32], index: 0, kind: input, shape index: {}]   ;;  %s2844_s1 = inlined_call_operand.vmem [shape: bf16[32,96], index: 1, kind: input, shape index: {}]   ;;  %s2845_s2 = inlined_call_operand.vmem [shape: bf16[1,96], index: 2, kind: input, shape index: {}]   ;;  %s2846_s3 = inlined_call_operand.vmem [shape: bf16[3,96], index: 3, kind: input, shape index: {}]   ;;  %s2847_s4 = inlined_call_operand.vmem [shape: bf16[1,96], index: 4, kind: input, shape index: {}]   ;;  %s2848_s5 = inlined_call_operand.vmem [shape: f32[8,4], index: 5, kind: input, shape index: {}]   ;;  %s2849_s6 = inlined_call_operand.vmem [shape: f32[8,4], index: 6, kind: input, shape index: {}]   ;;  %s2850_s7 = inlined_call_operand.vmem [shape: bf16[32,32], index: 7, kind: input, shape index: {}]   ;;  %s2851_s8 = inlined_call_operand.vmem [shape: bf16[1,32], index: 8, kind: input, shape index: {}]   ;;  %s2852_s9 = inlined_call_operand.vmem [shape: bf16[1,32], index: 9, kind: input, shape index: {}]   ;;  %s2853_s10 = inlined_call_operand.vmem [shape: bf16[1,32], index: 10, kind: input, shape index: {}]   ;;  %s2854_s11 = inlined_call_operand.vmem [shape: bf16[32,128], index: 11, kind: input, shape index: {}]   ;;  %s2855_s12 = inlined_call_operand.vmem [shape: bf16[128,32], index: 12, kind: input, shape index: {}]   ;;  %s2856_s13 = inlined_call_operand.hbm [shape: bf16[2,8,32], index: 13, kind: output, shape index: {}]  }
   0x1   :  { %2858 = sst [smem:[#allocation7_spill]] %s2843_s0 }
   0x2   :  { %2859 = sst [smem:[#allocation8_spill]] %s2844_s1 }
   0x3   :  { %18 = vsyncpa [#allocation5], 0 }
   0x4   :  { %20 = vsyncpa [#allocation5 + $0x1], 0  ;;  %s2436_s25 = smov 0   ;;  %s2438_s26 = smov 0  }
   0x5   :  { %s2440_s27 = smov 0   ;;  %s2442_s28 = smov 0  }
   0x6 LB: > { %s2457_s29 = sadd.s32 4294967295, %s2329_s28   ;;  %s1925_s30 = sadd.s32 4294967294, %s2329_s28   ;;  %s2329_s28 = sphi %s2442_s28, %s2868_s28   ;;  %s2325_s27 = sphi %s2440_s27, %s2867_s27   ;;  %s2321_s26 = sphi %s2438_s26, %s2866_s26   ;;  %s2317_s25 = sphi %s2436_s25, %s2865_s25  }
   0x7   : > { %s2461_s14 = sadd.s32 1, %s2329_s28   ;;  %s311_s15 = sadd.s32 1, %s2325_s27 }
   0x8   : > { %s308_s16 = ssub.s32 %s2329_s28, %s2461_s14  ;;  %p321_p0 = scmp.ne.s32.totalorder %s2325_s27, %s2321_s26 }
   0x9   : > { %p309_p1 = scmp.eq.s32.totalorder %s308_s16, 0  ;;  %p322_p2 = scmp.eq.s32.totalorder %s2457_s29, 1 }
   0xa   : > { %p327_p3 = scmp.ne.s32.totalorder %s2321_s26, %s2317_s25  ;;  %p328_p4 = scmp.eq.s32.totalorder %s1925_s30, 1 }
   0xb   : > { %s2472_s17 = scalar_select %p309_p1, %s2325_s27, %s311_s15  }
   0xc   : > { %p2474_p5 = por %p322_p2, %p321_p0  ;;  %p2478_p6 = por %p328_p4, %p327_p3 }
   0xd   : > { %p1928_p7 = scmp.ge.s32.totalorder %s2329_s28, 1  ;;  %p389_p8 = scmp.lt.s32.totalorder %s2329_s28, 3 }
   0xf   : > { %p390_p9 = pnand %p1928_p7, %p389_p8 }
  0x10   : > { %s2862_s1 = sld [smem:[#allocation8_spill]] (!%p390_p9)  ;;  %v2331_v1 = vmov (!%p390_p9), 0.0   ;;  %vm2332_vm0 = vmmov (!%p390_p9), 0   ;;  %p432_p10 = scmp.lt.s32.totalorder (!%p390_p9), %s2457_s29, 1  ;;  %v2498_v3 = vld [vmem:[%s2849_s6] sm:$0xff] (!%p390_p9)  ;;  %vm460_vm1 = vcmask (!%p390_p9), 261120   ;;  %v444_v6 = vlaneseq (!%p390_p9) }
  0x11   : > { %393 = sbr.rel (%p390_p9) target bundleno = 3322 (0xcfa), region = 72  ;;  %2012 = vmatprep.subr.bf16.mxu1 (!%p390_p9), %v2331_v1  ;;  %2038 = vmatprep.subr.bf16.mxu0 (!%p390_p9), %v2331_v1  ;;  %s2333_s15 = smov (!%p390_p9), 32   ;;  %v2521_v5 = vld [vmem:[%s2848_s5] sm:$0xff] (!%p390_p9)  ;;  %vm504_vm2 = vcmask (!%p390_p9), 779264   ;;  %vm506_vm3 = vcmask (!%p390_p9), 785408   ;;  %vm602_vm4 = vcmask (!%p390_p9), 31744  }
  0x12   : > { %2016 = vmatprep.mubr.msk.bf16.mxu1 (!%p390_p9), %vm2332_vm0, %v2331_v1  ;;  %583 = vrot.lane.b32.xlu0 (!%p390_p9), %v2498_v3, %s2333_s15  ;;  %s2334_s21 = smov (!%p390_p9), 36   ;;  %s2863_s0 = sld [smem:[#allocation7_spill]] (!%p390_p9)  ;;  %505 = vst.msk [vmem:[#allocation2] sm:$0x3] (!%p390_p9), %vm504_vm2, %v2331_v1  ;;  %v445_v7 = vshrl.u32 (!%p390_p9), %v444_v6, 7  ;;  %vm698_vm5 = vcmask (!%p390_p9), 64512  }
  0x13   : > { %2040 = vmatprep.mubr.msk.bf16.mxu0 (!%p390_p9), %vm2332_vm0, %v2331_v1  ;;  %570 = vrot.lane.b32.xlu1 (!%p390_p9), %v2498_v3, %s2334_s21  ;;  %s2857_s30 = smov (!%p390_p9), 40   ;;  %s2338_s23 = smov (!%p390_p9), 12   ;;  %v442_v8 = vld [vmem:[%s2845_s2] sm:$0x1] (!%p390_p9)  ;;  %v512_v16 = vld [vmem:[%s2846_s3] sm:$0x2] (!%p390_p9) }
  0x14   : > { %v443_v9 = vunpack.c.l.bf16 (!%p390_p9), %v442_v8  ;;  %v2536_v10 = vsub.s32 (!%p390_p9), 0, %v445_v7  ;;  %v510_v13 = vld [vmem:[%s2846_s3] sm:$0x1] (!%p390_p9)  ;;  %v521_v19 = vsub.s32 (!%p390_p9), 1, %v445_v7  ;;  %v513_v21 = vunpack.c.l.bf16 (!%p390_p9), %v512_v16  ;;  %s2343_s22 = smov (!%p390_p9), 96  }
  0x15   : > { %v511_v18 = vunpack.c.l.bf16 (!%p390_p9), %v510_v13  ;;  %v527_v22 = vsub.s32 (!%p390_p9), 2, %v445_v7  ;;  %v531_v23 = vld [vmem:[%s2847_s4] sm:$0x1] (!%p390_p9)  ;;  %vm718_vm6 = vcmask (!%p390_p9), 1043456   ;;  %vm1850_vm8 = vcmask (!%p390_p9), 257024  }
  0x16   : > { %v2233_v0 = vld [vmem:[%s2862_s1] sm:$0xff] (!%p390_p9)   ;;  %v2234_v2 = vld [vmem:[%s2862_s1 + $0x8] sm:$0xff] (!%p390_p9)   ;;  %809 = vrot.lane.b32.xlu0 (!%p390_p9), %v2498_v3, %s2857_s30  ;;  %s2336_s1 = smov (!%p390_p9), 8   ;;  %v447_v11 = vrot.slane (!%p390_p9), %v443_v9, %v2536_v10  ;;  %v532_v27 = vunpack.c.l.bf16 (!%p390_p9), %v531_v23 }
  0x17   : > { %2013 = vmatpush3.bf16.msra.mxu1 (!%p390_p9), %v2233_v0  ;;  %782 = vrot.lane.b32.xlu1 (!%p390_p9), %v2498_v3, %s2336_s1  ;;  %v517_v24 = vrot.slane (!%p390_p9), %v511_v18, %v2536_v10  ;;  %v522_v25 = vrot.slane (!%p390_p9), %v511_v18, %v521_v19  ;;  %v528_v26 = vrot.slane (!%p390_p9), %v513_v21, %v527_v22 }
  0x18   : > { %2014 = vmatprep.subr.bf16.mxu1 %v2331_v1  ;;  %s433_s16 = scalar_select %p432_p10, %s2457_s29, 1  ;;  %v536_v34 = vrot.slane %v532_v27, %v2536_v10 }
  0x1a   : > { %s1930_s20 = sshll.u32 %s433_s16, 2  ;;  %s2337_s16 = smov 44  }
  0x1b   : > { %2015 = vmatpush3.bf16.msra.mxu1 %v2234_v2  ;;  %s435_s24 = scalar_lea.vmem %s2863_s0, %s1930_s20  ;;  %796 = vrot.lane.b32.xlu0 %v2498_v3, %s2337_s16  ;;  %s2345_s20 = smov 88  }
  0x1c   : > { %2020 = vmatprep.subr.bf16.mxu1 %v2331_v1  ;;  %v437_v4 = vld [vmem:[%s435_s24] sm:$0xf]  ;;  %768 = vrot.lane.b32.xlu1 %v2498_v3, %s2338_s23  ;;  %s2339_s24 = smov 4  }
  0x1e   : > { %2017 = vmatmul.mubr.msk.bf16.vlgmr.msra.gmra.mrb[0].mxu1 %vm460_vm1, %v437_v4 }
  0x1f   : > { %2022 = vmatprep.mubr.msk.bf16.mxu1 %vm2332_vm0, %v2331_v1  ;;  %579 = vrot.lane.b32.xlu0 %v2521_v5, %s2334_s21  ;;  %s2346_s21 = smov 120  }
  0x23   : > { %555 = vrot.lane.b32.xlu0 %v2521_v5, %s2339_s24 }
  0x27   : > { %805 = vrot.lane.b32.xlu0 %v2521_v5, %s2337_s16  ;;  %s2341_s16 = smov 92  }
  0x2b   : > { %566 = vrot.lane.b32.xlu0 %v2521_v5, %s2333_s15  ;;  %s2340_s15 = smov 124  }
  0x2f   : > { %778 = vrot.lane.b32.xlu0 %v2521_v5, %s2338_s23  ;;  %s2344_s23 = smov 116  }
  0x33   : > { %544 = vrot.lane.b32.xlu0 %v2498_v3, %s2339_s24 }
  0x84   : > { %v584_v35 = vpop.permute.xlu0 %583 }
  0x85   : > { %v571_v37 = vpop.permute.xlu1 %570 }
  0x88   : > { %v810_v39 = vpop.permute.xlu0 %809 }
  0x89   : > { %v783_v40 = vpop.permute.xlu1 %782 }
  0x8d   : > { %v797_v42 = vpop.permute.xlu0 %796 }
  0x8e   : > { %v769_v45 = vpop.permute.xlu1 %768 }
  0x91   : > { %v580_v51 = vpop.permute.xlu0 %579 }
  0x95   : > { %v556_v52 = vpop.permute.xlu0 %555 }
  0x99   : > { %v806_v53 = vpop.permute.xlu0 %805 }
  0x9d   : > { %v567_v55 = vpop.permute.xlu0 %566 }
  0xa1   : > { %v779_v62 = vpop.permute.xlu0 %778 }
  0xa5   : > { %v545_v9 = vpop.permute.xlu0 %544 }
  0xf1   : > { %v498_v12 = vpop.f32.mrb[0].mxu1 }
  0xf2   : > { %v499_v14 = vadd.f32 %v498_v12, %v447_v11  ;;  %v2018_v15 = vpop.f32.mrb[1].mxu1 }
  0xf3   : > { %v501_v17 = vpop.f32.mrb[2].mxu1 }
  0xf4   : > { %507 = vst.msk [vmem:[#allocation2 + $0x2] sm:$0xff] %vm506_vm3, %v499_v14  ;;  %v2019_v20 = vpop.f32.mrb[3].mxu1  ;;  %v529_v33 = vmul.f32 %v528_v26, %v499_v14 }
  0xfb   : > { %v508_v28 = vld [vmem:[#allocation2 + $0x1] sm:$0xff] }
  0xfc   : > { %v509_v29 = vld [vmem:[#allocation2] sm:$0xff]  ;;  %v523_v31 = vmul.f32 %v522_v25, %v508_v28 }
  0xfd   : > { %v518_v30 = vmul.f32 %v517_v24, %v509_v29 }
  0xff   : > { %v524_v32 = vadd.f32 %v523_v31, %v518_v30 }
 0x101   : > { %v530_v36 = vadd.f32 %v529_v33, %v524_v32 }
 0x103   : > { %v537_v38 = vadd.f32 %v536_v34, %v530_v36 }
 0x105   : > { %538 = vst.msk [vmem:[#allocation3] sm:$0xff] %vm506_vm3, %v537_v38 }
 0x10c   : > { %v2552_v41 = vld [vmem:[#allocation3] sm:$0xff] }
 0x10d   : > { %v586_v43 = vmul.f32 %v584_v35, %v2552_v41  ;;  %v799_v44 = vmul.f32 %v797_v42, %v2552_v41  ;;  %v771_v46 = vmul.f32 %v769_v45, %v2552_v41  ;;  %v559_v47 = vmul.f32 %v2552_v41, %v2498_v3 }
 0x10e   : > { %v812_v48 = vmul.f32 %v810_v39, %v2552_v41  ;;  %v573_v49 = vmul.f32 %v571_v37, %v2552_v41  ;;  %v785_v50 = vmul.f32 %v783_v40, %v2552_v41  ;;  %v582_v54 = vmul.f32 %v580_v51, %v2552_v41 }
 0x10f   : > { %801 = vrot.lane.b32.xlu0 %v799_v44, %s2340_s15  ;;  %588 = vrot.lane.b32.xlu1 %v586_v43, %s2339_s24  ;;  %v558_v58 = vmul.f32 %v556_v52, %v2552_v41  ;;  %v808_v63 = vmul.f32 %v806_v53, %v2552_v41  ;;  %v569_v7 = vmul.f32 %v567_v55, %v2552_v41 }
 0x110   : > { %v781_v13 = vmul.f32 %v779_v62, %v2552_v41  ;;  %v547_v14 = vmul.f32 %v545_v9, %v2552_v41  ;;  %v542_v36 = vmul.f32 %v2552_v41, %v2521_v5 }
 0x113   : > { %773 = vrot.lane.b32.xlu0 %v771_v46, %s2340_s15  ;;  %561 = vrot.lane.b32.xlu1 %v559_v47, %s2339_s24 }
 0x117   : > { %814 = vrot.lane.b32.xlu1 %v812_v48, %s2339_s24 }
 0x11b   : > { %575 = vrot.lane.b32.xlu1 %v573_v49, %s2340_s15 }
 0x11f   : > { %787 = vrot.lane.b32.xlu1 %v785_v50, %s2339_s24 }
 0x123   : > { %792 = vrot.lane.b32.xlu1 %v2521_v5, %s2857_s30  ;;  %s2358_s30 = smov 24  }
 0x127   : > { %764 = vrot.lane.b32.xlu1 %v2521_v5, %s2336_s1  ;;  %s2342_s1 = smov 84  }
 0x181   : > { %v589_v56 = vpop.permute.xlu1 %588  ;;  %v802_v19 = vpop.permute.xlu0 %801 }
 0x182   : > { %v591_v57 = vadd.f32 %v589_v56, %v582_v54 }
 0x184   : > { %v595_v59 = vpack.c.bf16 %v591_v57, %v591_v57 }
 0x185   : > { %v562_v60 = vpop.permute.xlu1 %561  ;;  %v774_v27 = vpop.permute.xlu0 %773 }
 0x186   : > { %v564_v61 = vadd.f32 %v562_v60, %v558_v58  ;;  %600 = vrot.lane.b32.xlu1 %v595_v59, %s2341_s16  ;;  %s2347_s16 = smov 64  }
 0x188   : > { %v565_v0 = vmul.f32 0.35355338, %v564_v61 }
 0x189   : > { %v815_v2 = vpop.permute.xlu1 %814 }
 0x18a   : > { %v594_v4 = vpack.c.bf16 %v565_v0, %v565_v0  ;;  %v817_v6 = vadd.f32 %v815_v2, %v808_v63 }
 0x18c   : > { %v821_v8 = vpack.c.bf16 %v817_v6, %v817_v6  ;;  %597 = vrot.lane.b32.xlu0 %v594_v4, %s2340_s15 }
 0x18d   : > { %v576_v11 = vpop.permute.xlu1 %575 }
 0x18e   : > { %v578_v12 = vsub.f32 %v569_v7, %v576_v11  ;;  %826 = vrot.lane.b32.xlu1 %v821_v8, %s2342_s1  ;;  %v2611_v7 = vpack.c.bf16 %v2552_v41, %v2552_v41  ;;  %s2348_s1 = smov 16  }
 0x190   : > { %v593_v15 = vpack.c.bf16 %v578_v12, %v578_v12 }
 0x191   : > { %v788_v16 = vpop.permute.xlu1 %787 }
 0x192   : > { %v790_v17 = vadd.f32 %v788_v16, %v781_v13  ;;  %650 = vrot.lane.b32.xlu0 %v593_v15, %s2343_s22  ;;  %549 = vrot.lane.b32.xlu1 %v547_v14, %s2340_s15  ;;  %s2349_s22 = smov 56  }
 0x194   : > { %v791_v18 = vmul.f32 0.35355338, %v790_v17 }
 0x195   : > { %v793_v20 = vpop.permute.xlu1 %792 }
 0x196   : > { %v820_v21 = vpack.c.bf16 %v791_v18, %v791_v18  ;;  %v795_v22 = vmul.f32 %v793_v20, %v2552_v41 }
 0x198   : > { %v804_v23 = vsub.f32 %v795_v22, %v802_v19  ;;  %823 = vrot.lane.b32.xlu0 %v820_v21, %s2344_s23  ;;  %s2350_s23 = smov 20  }
 0x199   : > { %v765_v24 = vpop.permute.xlu1 %764 }
 0x19a   : > { %v819_v25 = vpack.c.bf16 %v804_v23, %v804_v23  ;;  %v767_v26 = vmul.f32 %v765_v24, %v2552_v41 }
 0x19c   : > { %v776_v28 = vsub.f32 %v767_v26, %v774_v27  ;;  %878 = vrot.lane.b32.xlu1 %v819_v25, %s2345_s20  ;;  %s2351_s20 = smov 48  }
 0x19e   : > { %v777_v29 = vmul.f32 0.35355338, %v776_v28 }
 0x1a0   : > { %v818_v30 = vpack.c.bf16 %v777_v29, %v777_v29  ;;  %v763_v29 = vld [vmem:[%s2850_s7] sm:$0xf] }
 0x1a2   : > { %875 = vrot.lane.b32.xlu0 %v818_v30, %s2346_s21  ;;  %s2352_s21 = smov 52   ;;  %v1038_v30 = vsel %vm718_vm6, %v763_v29, 0 }
 0x1f8   : > { %v601_v31 = vpop.permute.xlu1 %600 }
 0x1f9   : > { %v607_v32 = vsel %vm602_vm4, %v601_v31, 0  ;;  %v987_v31 = vld [vmem:[%s2850_s7 + $0x4] sm:$0xf] }
 0x1fa   : > { %2021 = vmatpush3.bf16.xpose.msra.mxu1 %v607_v32  ;;  %v992_v32 = vsel %vm718_vm6, %v987_v31, 0 }
 0x1fb   : > { %2026 = vmatprep.subr.bf16.mxu1 %v2331_v1 }
 0x1fe   : > { %v598_v33 = vpop.permute.xlu0 %597 }
 0x200   : > { %v827_v34 = vpop.permute.xlu1 %826 }
 0x201   : > { %2023 = vmatmul.mubr.msk.bf16.vlgmr.msra.gmra.mrb[4].mxu1 %vm602_vm4, %v598_v33  ;;  %v832_v35 = vsel %vm602_vm4, %v827_v34, 0 }
 0x202   : > { %2039 = vmatpush3.bf16.xpose.msra.mxu0 %v832_v35  ;;  %2028 = vmatprep.mubr.msk.bf16.mxu1 %vm2332_vm0, %v2331_v1 }
 0x203   : > { %2044 = vmatprep.subr.bf16.mxu0 %v2331_v1 }
 0x204   : > { %v651_v37 = vpop.permute.xlu0 %650  ;;  %v550_v38 = vpop.permute.xlu1 %549 }
 0x205   : > { %v656_v39 = vsel %vm602_vm4, %v651_v37, 0  ;;  %v552_v40 = vsub.f32 %v542_v36, %v550_v38 }
 0x206   : > { %2027 = vmatpush3.bf16.xpose.msra.mxu1 %v656_v39 }
 0x207   : > { %v553_v42 = vmul.f32 0.35355338, %v552_v40  ;;  %2032 = vmatprep.subr.bf16.mxu1 %v2331_v1 }
 0x209   : > { %v592_v44 = vpack.c.bf16 %v553_v42, %v553_v42 }
 0x20a   : > { %v824_v43 = vpop.permute.xlu0 %823 }
 0x20b   : > { %2041 = vmatmul.mubr.msk.bf16.vlgmr.msra.gmra.mrb[0].mxu0 %vm602_vm4, %v824_v43 }
 0x20c   : > { %2046 = vmatprep.mubr.msk.bf16.mxu0 %vm2332_vm0, %v2331_v1 }
 0x20d   : > { %2029 = vmatmul.mubr.msk.bf16.vlgmr.msra.gmra.mrb[4].mxu1 %vm602_vm4, %v592_v44 }
 0x20e   : > { %v879_v45 = vpop.permute.xlu1 %878  ;;  %2034 = vmatprep.mubr.msk.bf16.mxu1 %vm2332_vm0, %v2331_v1 }
 0x20f   : > { %v884_v46 = vsel %vm602_vm4, %v879_v45, 0 }
 0x210   : > { %2045 = vmatpush3.bf16.xpose.msra.mxu0 %v884_v46 }
 0x211   : > { %2062 = vmatprep.subr.bf16.mxu0 %v2331_v1 }
 0x214   : > { %v876_v47 = vpop.permute.xlu0 %875 }
 0x217   : > { %2047 = vmatmul.mubr.msk.bf16.vlgmr.msra.gmra.mrb[0].mxu0 %vm602_vm4, %v876_v47 }
 0x218   : > { %2064 = vmatprep.mubr.msk.bf16.mxu0 %vm2332_vm0, %v2331_v1  ;;  %2063 = vmatpush3.bf16.msra.mxu0 %v1038_v30 }
 0x219   : > { %2080 = vmatprep.subr.bf16.mxu0 %v2331_v1 }
 0x2e0   : > { %v692_v48 = vpop.f32.mrb[4].mxu1 }
 0x2e1   : > { %v2030_v49 = vpop.f32.mrb[5].mxu1  ;;  %v699_v50 = vsel %vm698_vm5, %v692_v48, -inf }
 0x2e2   : > { %700 = vmax.xlane.f32.xlu1 %v699_v50  ;;  %v695_v51 = vpop.f32.mrb[6].mxu1 }
 0x2e3   : > { %v2031_v52 = vpop.f32.mrb[7].mxu1 }
 0x2ea   : > { %v920_v53 = vpop.f32.mrb[0].mxu0 }
 0x2eb   : > { %v2048_v54 = vpop.f32.mrb[1].mxu0  ;;  %v926_v55 = vsel %vm698_vm5, %v920_v53, -inf }
 0x2ec   : > { %927 = vmax.xlane.f32.xlu0 %v926_v55  ;;  %v923_v56 = vpop.f32.mrb[2].mxu0 }
 0x2ed   : > { %v2049_v57 = vpop.f32.mrb[3].mxu0 }
 0x36f   : > { %v701_v58 = vpop.xlane.xlu1 %700 }
 0x370   : > { %v702_v59 = vsub.f32 %v692_v48, %v701_v58 }
 0x372   : > { %v703_v60 = vmul.f32 1.442695, %v702_v59 }
 0x374   : > { %2245 = vpow2.f32 %v703_v60 }
 0x379   : > { %v928_v61 = vpop.xlane.xlu0 %927 }
 0x37a   : > { %v929_v62 = vsub.f32 %v920_v53, %v928_v61 }
 0x37c   : > { %v930_v63 = vmul.f32 1.442695, %v929_v62 }
 0x37e   : > { %v2246_v0 = vpop.eup %2245  ;;  %2247 = vpow2.f32 %v930_v63 }
 0x37f   : > { %v705_v2 = vsel %vm698_vm5, %v2246_v0, 0.0 }
 0x380   : > { %706 = vadd.xlane.f32.xlu0 %v705_v2 }
 0x388   : > { %v2248_v4 = vpop.eup %2247 }
 0x389   : > { %v932_v6 = vsel %vm698_vm5, %v2248_v4, 0.0 }
 0x38a   : > { %933 = vadd.xlane.f32.xlu1 %v932_v6 }
 0x396   : > { %713 = vrot.lane.b32.xlu0 %v2611_v7, %s2347_s16  ;;  %s2353_s16 = smov 76  }
 0x39a   : > { %1098 = vrot.lane.b32.xlu0 %v2498_v3, %s2348_s1 }
 0x39b   : > { %938 = vrot.lane.b32.xlu1 %v2611_v7, %s2349_s22 }
 0x39e   : > { %1084 = vrot.lane.b32.xlu0 %v2498_v3, %s2350_s23 }
 0x39f   : > { %1125 = vrot.lane.b32.xlu1 %v2498_v3, %s2351_s20 }
 0x3a3   : > { %1112 = vrot.lane.b32.xlu1 %v2498_v3, %s2352_s21 }
 0x3a7   : > { %1121 = vrot.lane.b32.xlu1 %v2521_v5, %s2352_s21  ;;  %s2356_s21 = smov 112  }
 0x3ab   : > { %1094 = vrot.lane.b32.xlu1 %v2521_v5, %s2350_s23  ;;  %s2355_s23 = smov 80  }
 0x3af   : > { %1108 = vrot.lane.b32.xlu1 %v2521_v5, %s2351_s20 }
 0x3b3   : > { %1080 = vrot.lane.b32.xlu1 %v2521_v5, %s2348_s1  ;;  %s2354_s1 = smov 108  }
 0x40d   : > { %v707_v8 = vpop.xlane.xlu0 %706 }
 0x40e   : > { %2249 = vrcp.f32 %v707_v8 }
 0x411   : > { %v714_v9 = vpop.permute.xlu0 %713 }
 0x412   : > { %v720_v11 = vsel %vm718_vm6, %v714_v9, 0 }
 0x413   : > { %2033 = vmatpush3.bf16.msra.mxu1 %v720_v11 }
 0x414   : > { %2050 = vmatprep.subr.bf16.mxu1 %v2331_v1 }
 0x415   : > { %v1099_v20 = vpop.permute.xlu0 %1098 }
 0x416   : > { %v1101_v23 = vmul.f32 %v1099_v20, %v2552_v41 }
 0x417   : > { %v934_v12 = vpop.xlane.xlu1 %933 }
 0x418   : > { %v2250_v13 = vpop.eup %2249  ;;  %2251 = vrcp.f32 %v934_v12 }
 0x419   : > { %v709_v14 = vmul.f32 %v2250_v13, %v2246_v0  ;;  %v1085_v27 = vpop.permute.xlu0 %1084 }
 0x41a   : > { %v1087_v28 = vmul.f32 %v1085_v27, %v2552_v41 }
 0x41b   : > { %v939_v15 = vpop.permute.xlu1 %938  ;;  %v710_v16 = vpack.c.bf16 %v709_v14, %v709_v14 }
 0x41c   : > { %v944_v17 = vsel %vm718_vm6, %v939_v15, 0 }
 0x41d   : > { %2035 = vmatmul.mubr.msk.bf16.vlgmr.msra.gmra.mrb[8].mxu1 %vm698_vm5, %v710_v16 }
 0x41e   : > { %2051 = vmatpush3.bf16.msra.mxu1 %v944_v17  ;;  %2052 = vmatprep.mubr.msk.bf16.mxu1 %vm2332_vm0, %v2331_v1 }
 0x41f   : > { %v1126_v18 = vpop.permute.xlu1 %1125  ;;  %2056 = vmatprep.subr.bf16.mxu1 %v2331_v1 }
 0x420   : > { %v1128_v19 = vmul.f32 %v1126_v18, %v2552_v41 }
 0x422   : > { %v2252_v21 = vpop.eup %2251  ;;  %1130 = vrot.lane.b32.xlu0 %v1128_v19, %s2339_s24 }
 0x423   : > { %v936_v22 = vmul.f32 %v2252_v21, %v2248_v4  ;;  %v1113_v24 = vpop.permute.xlu1 %1112 }
 0x424   : > { %v1115_v26 = vmul.f32 %v1113_v24, %v2552_v41 }
 0x425   : > { %v937_v25 = vpack.c.bf16 %v936_v22, %v936_v22 }
 0x426   : > { %1103 = vrot.lane.b32.xlu0 %v1101_v23, %s2339_s24 }
 0x427   : > { %2053 = vmatmul.mubr.msk.bf16.vlgmr.msra.gmra.mrb[12].mxu1 %vm698_vm5, %v937_v25  ;;  %v1122_v33 = vpop.permute.xlu1 %1121 }
 0x428   : > { %2058 = vmatprep.mubr.msk.bf16.mxu1 %vm2332_vm0, %v2331_v1  ;;  %2057 = vmatpush3.bf16.msra.mxu1 %v992_v32  ;;  %v1124_v35 = vmul.f32 %v1122_v33, %v2552_v41 }
 0x429   : > { %2068 = vmatprep.subr.bf16.mxu1 %v2331_v1 }
 0x42a   : > { %1117 = vrot.lane.b32.xlu0 %v1115_v26, %s2340_s15 }
 0x42b   : > { %v1095_v34 = vpop.permute.xlu1 %1094 }
 0x42c   : > { %v1097_v39 = vmul.f32 %v1095_v34, %v2552_v41 }
 0x42e   : > { %1089 = vrot.lane.b32.xlu0 %v1087_v28, %s2340_s15 }
 0x42f   : > { %v1109_v38 = vpop.permute.xlu1 %1108 }
 0x430   : > { %v1111_v44 = vmul.f32 %v1109_v38, %v2552_v41 }
 0x433   : > { %v1081_v46 = vpop.permute.xlu1 %1080 }
 0x434   : > { %v1083_v50 = vmul.f32 %v1081_v46, %v2552_v41 }
 0x494   : > { %v1131_v36 = vpop.permute.xlu0 %1130 }
 0x495   : > { %v1133_v37 = vadd.f32 %v1131_v36, %v1124_v35 }
 0x497   : > { %v1137_v40 = vpack.c.bf16 %v1133_v37, %v1133_v37 }
 0x498   : > { %v1104_v42 = vpop.permute.xlu0 %1103 }
 0x499   : > { %v1106_v43 = vadd.f32 %v1104_v42, %v1097_v39  ;;  %1142 = vrot.lane.b32.xlu1 %v1137_v40, %s2353_s16  ;;  %s2357_s16 = smov 60  }
 0x49b   : > { %v1107_v45 = vmul.f32 0.35355338, %v1106_v43 }
 0x49c   : > { %v1118_v47 = vpop.permute.xlu0 %1117 }
 0x49d   : > { %v1136_v48 = vpack.c.bf16 %v1107_v45, %v1107_v45  ;;  %v1120_v49 = vsub.f32 %v1111_v44, %v1118_v47 }
 0x49f   : > { %v1135_v51 = vpack.c.bf16 %v1120_v49, %v1120_v49  ;;  %1139 = vrot.lane.b32.xlu0 %v1136_v48, %s2354_s1  ;;  %s2359_s1 = smov 28  }
 0x4a0   : > { %v1090_v52 = vpop.permute.xlu0 %1089 }
 0x4a1   : > { %v1092_v53 = vsub.f32 %v1083_v50, %v1090_v52  ;;  %1194 = vrot.lane.b32.xlu1 %v1135_v51, %s2355_s23 }
 0x4a3   : > { %v1093_v54 = vmul.f32 0.35355338, %v1092_v53 }
 0x4a5   : > { %v1134_v55 = vpack.c.bf16 %v1093_v54, %v1093_v54  ;;  %1396 = vrot.lane.b32.xlu1 %v2498_v3, %s2349_s22 }
 0x4a7   : > { %1191 = vrot.lane.b32.xlu0 %v1134_v55, %s2356_s21  ;;  %s2864_s21 = smov 40  }
 0x4a9   : > { %1383 = vrot.lane.b32.xlu1 %v2498_v3, %s2357_s16 }
 0x4ab   : > { %1369 = vrot.lane.b32.xlu0 %v2498_v3, %s2358_s30 }
 0x4ad   : > { %1392 = vrot.lane.b32.xlu1 %v2521_v5, %s2357_s16 }
 0x4af   : > { %1355 = vrot.lane.b32.xlu0 %v2498_v3, %s2359_s1 }
 0x4b1   : > { %1365 = vrot.lane.b32.xlu1 %v2521_v5, %s2359_s1  ;;  %s429_s1 = sand.u32 1, %s2321_s26  }
 0x4b5   : > { %1379 = vrot.lane.b32.xlu1 %v2521_v5, %s2349_s22  ;;  %s2363_s22 = smov 104  }
 0x4b9   : > { %1351 = vrot.lane.b32.xlu1 %v2521_v5, %s2358_s30  ;;  %s2360_s30 = smov 68  }
 0x4f0   : > { %v756_v56 = vpop.f32.mrb[8].mxu1 }
 0x4f1   : > { %v762_v57 = vpack.c.bf16 %v756_v56, %v756_v56  ;;  %v2036_v58 = vpop.f32.mrb[9].mxu1 }
 0x4f2   : > { %v759_v59 = vpop.f32.mrb[10].mxu1 }
 0x4f3   : > { %v2037_v60 = vpop.f32.mrb[11].mxu1  ;;  %2065 = vmatmul.mubr.msk.bf16.vlgmr.msra.gmra.mrb[4].mxu0 %vm698_vm5, %v762_v57 }
 0x4f4   : > { %2082 = vmatprep.mubr.msk.bf16.mxu0 %vm2332_vm0, %v2331_v1 }
 0x4fa   : > { %v980_v61 = vpop.f32.mrb[12].mxu1 }
 0x4fb   : > { %v986_v62 = vpack.c.bf16 %v980_v61, %v980_v61  ;;  %v2054_v3 = vpop.f32.mrb[13].mxu1 }
 0x4fc   : > { %v983_v63 = vpop.f32.mrb[14].mxu1 }
 0x4fd   : > { %v2055_v0 = vpop.f32.mrb[15].mxu1  ;;  %2059 = vmatmul.mubr.msk.bf16.vlgmr.msra.gmra.mrb[16].mxu1 %vm698_vm5, %v986_v62 }
 0x4fe   : > { %2070 = vmatprep.mubr.msk.bf16.mxu1 %vm2332_vm0, %v2331_v1 }
 0x50b   : > { %v1143_v5 = vpop.permute.xlu1 %1142 }
 0x50c   : > { %v1148_v2 = vsel %vm602_vm4, %v1143_v5, 0 }
 0x50d   : > { %2069 = vmatpush3.bf16.xpose.msra.mxu1 %v1148_v2 }
 0x50e   : > { %2074 = vmatprep.subr.bf16.mxu1 %v2331_v1 }
 0x511   : > { %v1140_v4 = vpop.permute.xlu0 %1139 }
 0x513   : > { %v1195_v6 = vpop.permute.xlu1 %1194 }
 0x514   : > { %v1200_v8 = vsel %vm602_vm4, %v1195_v6, 0  ;;  %2071 = vmatmul.mubr.msk.bf16.vlgmr.msra.gmra.mrb[20].mxu1 %vm602_vm4, %v1140_v4 }
 0x515   : > { %2075 = vmatpush3.bf16.xpose.msra.mxu1 %v1200_v8  ;;  %2076 = vmatprep.mubr.msk.bf16.mxu1 %vm2332_vm0, %v2331_v1 }
 0x516   : > { %2092 = vmatprep.subr.bf16.mxu1 %v2331_v1 }
 0x517   : > { %v1397_v9 = vpop.permute.xlu1 %1396 }
 0x518   : > { %v1399_v11 = vmul.f32 %v1397_v9, %v2552_v41 }
 0x519   : > { %v1192_v12 = vpop.permute.xlu0 %1191 }
 0x51a   : > { %1401 = vrot.lane.b32.xlu0 %v1399_v11, %s2339_s24 }
 0x51b   : > { %v1384_v15 = vpop.permute.xlu1 %1383 }
 0x51c   : > { %v1386_v16 = vmul.f32 %v1384_v15, %v2552_v41 }
 0x51d   : > { %v1370_v13 = vpop.permute.xlu0 %1369 }
 0x51e   : > { %v1372_v14 = vmul.f32 %v1370_v13, %v2552_v41 }
 0x51f   : > { %v1393_v19 = vpop.permute.xlu1 %1392 }
 0x520   : > { %1374 = vrot.lane.b32.xlu0 %v1372_v14, %s2339_s24  ;;  %2077 = vmatmul.mubr.msk.bf16.vlgmr.msra.gmra.mrb[20].mxu1 %vm602_vm4, %v1192_v12  ;;  %v1395_v21 = vmul.f32 %v1393_v19, %v2552_v41  ;;  %s2361_s24 = smov 100   ;;  %v1303_v19 = vld [vmem:[%s2850_s7 + $0x8] sm:$0xf] }
 0x521   : > { %2094 = vmatprep.mubr.msk.bf16.mxu1 %vm2332_vm0, %v2331_v1  ;;  %v1356_v17 = vpop.permute.xlu0 %1355 }
 0x522   : > { %v1358_v18 = vmul.f32 %v1356_v17, %v2552_v41 }
 0x523   : > { %v1366_v20 = vpop.permute.xlu1 %1365 }
 0x524   : > { %1388 = vrot.lane.b32.xlu0 %v1386_v16, %s2340_s15  ;;  %v1368_v26 = vmul.f32 %v1366_v20, %v2552_v41  ;;  %v1308_v20 = vsel %vm718_vm6, %v1303_v19, 0  ;;  %v2242_v19 = vld [vmem:[%s2855_s12 + $0x28] sm:$0xff]  }
 0x527   : > { %v1380_v25 = vpop.permute.xlu1 %1379 }
 0x528   : > { %1360 = vrot.lane.b32.xlu0 %v1358_v18, %s2340_s15  ;;  %v1382_v29 = vmul.f32 %v1380_v25, %v2552_v41  ;;  %s2362_s15 = smov 72  }
 0x52b   : > { %v1352_v31 = vpop.permute.xlu1 %1351 }
 0x52c   : > { %v1354_v35 = vmul.f32 %v1352_v31, %v2552_v41 }
 0x58c   : > { %v1402_v22 = vpop.permute.xlu0 %1401 }
 0x58d   : > { %v1404_v23 = vadd.f32 %v1402_v22, %v1395_v21 }
 0x58f   : > { %v1408_v24 = vpack.c.bf16 %v1404_v23, %v1404_v23 }
 0x591   : > { %1413 = vrot.lane.b32.xlu1 %v1408_v24, %s2360_s30  ;;  %s1929_s30 = sshll.u32 %s429_s1, 2 }
 0x592   : > { %v1375_v27 = vpop.permute.xlu0 %1374 }
 0x593   : > { %v1377_v28 = vadd.f32 %v1375_v27, %v1368_v26 }
 0x595   : > { %v1378_v30 = vmul.f32 0.35355338, %v1377_v28 }
 0x596   : > { %v1389_v32 = vpop.permute.xlu0 %1388 }
 0x597   : > { %v1407_v33 = vpack.c.bf16 %v1378_v30, %v1378_v30  ;;  %v1391_v34 = vsub.f32 %v1382_v29, %v1389_v32 }
 0x599   : > { %v1406_v36 = vpack.c.bf16 %v1391_v34, %v1391_v34  ;;  %1410 = vrot.lane.b32.xlu0 %v1407_v33, %s2361_s24  ;;  %v1574_v33 = vld [vmem:[%s2850_s7 + $0xc] sm:$0xf]  ;;  %s1962_s24 = sshll.u32 %s2457_s29, 6  ;;  %s1853_s29 = scalar_lea.sflag [#allocation5], %s429_s1 }
 0x59a   : > { %v1361_v37 = vpop.permute.xlu0 %1360  ;;  %v1579_v34 = vsel %vm718_vm6, %v1574_v33, 0 }
 0x59b   : > { %v1363_v38 = vsub.f32 %v1354_v35, %v1361_v37  ;;  %1465 = vrot.lane.b32.xlu1 %v1406_v36, %s2362_s15  ;;  %s431_s15 = scalar_lea.vmem [#allocation4], %s1929_s30  ;;  %s2365_s30 = smov [#allocation4]  }
 0x59c   : > { %s2271_s0 = sshll.u32 %s2365_s30, 4  ;;  %s2272_s0 = int_to_ptr.vmem [resolvable:$false] %s2271_s0 }
 0x59d   : > { %v1364_v39 = vmul.f32 0.35355338, %v1363_v38 }
 0x59f   : > { %v1405_v40 = vpack.c.bf16 %v1364_v39, %v1364_v39 }
 0x5a1   : > { %1462 = vrot.lane.b32.xlu0 %v1405_v40, %s2363_s22  ;;  %s1866_s22 = sshll.u32 %s431_s15, 4  ;;  %s2803_s22 = int_to_ptr.vmem [resolvable:$true] %s1866_s22 }
 0x5a2   : > { %s2267_s16 = scalar_lea.vmem %s2803_s22, 64  ;;  %p2274_p0 = scmp.lt.s32.totalorder %s2803_s22, %s2272_s0 }
 0x5a3   : > { %p2268_p11 = scmp.ne.s32.totalorder %s2803_s22, %s2267_s16 }
 0x5a5   : > { %p2269_p12 = pnand %p2268_p11, %p2474_p5 }
 0x5a7   : > { %p2270_p13 = pneg %p2269_p12 }
 0x5c6   : > { %v1074_v42 = vpop.f32.mrb[4].mxu0 }
 0x5c7   : > { %v2066_v43 = vpop.f32.mrb[5].mxu0 }
 0x5c8   : > { %v1077_v44 = vpop.f32.mrb[6].mxu0 }
 0x5c9   : > { %v2067_v45 = vpop.f32.mrb[7].mxu0 }
 0x5d0   : > { %v1028_v46 = vpop.f32.mrb[16].mxu1 }
 0x5d1   : > { %v2696_v47 = vadd.f32 %v1074_v42, %v1028_v46  ;;  %v2060_v48 = vpop.f32.mrb[17].mxu1  ;;  %v1622_v46 = vld [vmem:[%s2851_s8] sm:$0x1] }
 0x5d2   : > { %v1031_v41 = vpop.f32.mrb[18].mxu1  ;;  %v1623_v48 = vunpack.c.l.bf16 %v1622_v46 }
 0x5d3   : > { %v2061_v49 = vpop.f32.mrb[19].mxu1 }
 0x5f3   : > { %v1236_v50 = vpop.f32.mrb[20].mxu1 }
 0x5f4   : > { %v2078_v51 = vpop.f32.mrb[21].mxu1  ;;  %v1242_v52 = vsel %vm698_vm5, %v1236_v50, -inf }
 0x5f5   : > { %1243 = vmax.xlane.f32.xlu1 %v1242_v52  ;;  %v1239_v53 = vpop.f32.mrb[22].mxu1 }
 0x5f6   : > { %v2079_v54 = vpop.f32.mrb[23].mxu1 }
 0x603   : > { %v1414_v55 = vpop.permute.xlu1 %1413 }
 0x604   : > { %v1419_v56 = vsel %vm602_vm4, %v1414_v55, 0 }
 0x605   : > { %2093 = vmatpush3.bf16.xpose.msra.mxu1 %v1419_v56 }
 0x606   : > { %2098 = vmatprep.subr.bf16.mxu1 %v2331_v1 }
 0x60b   : > { %v1411_v57 = vpop.permute.xlu0 %1410 }
 0x60c   : > { %2095 = vmatmul.mubr.msk.bf16.vlgmr.msra.gmra.mrb[24].mxu1 %vm602_vm4, %v1411_v57 }
 0x60d   : > { %v1466_v58 = vpop.permute.xlu1 %1465  ;;  %2100 = vmatprep.mubr.msk.bf16.mxu1 %vm2332_vm0, %v2331_v1 }
 0x60e   : > { %v1471_v59 = vsel %vm602_vm4, %v1466_v58, 0 }
 0x60f   : > { %2099 = vmatpush3.bf16.xpose.msra.mxu1 %v1471_v59 }
 0x610   : > { %2116 = vmatprep.subr.bf16.mxu1 %v2331_v1 }
 0x613   : > { %v1463_v60 = vpop.permute.xlu0 %1462 }
 0x618   : > { %2101 = vmatmul.mubr.msk.bf16.vlgmr.msra.gmra.mrb[24].mxu1 %vm602_vm4, %v1463_v60  ;;  %v2235_v60 = vld [vmem:[%s2854_s11] sm:$0xff]  }
 0x619   : > { %2120 = vmatprep.mubr.msk.bf16.mxu1 %vm2332_vm0, %v2331_v1  ;;  %2117 = vmatpush3.bf16.msra.mxu1 %v2235_v60 }
 0x61a   : > { %2118 = vmatprep.subr.bf16.mxu1 %v2331_v1 }
 0x682   : > { %v1244_v61 = vpop.xlane.xlu1 %1243 }
 0x683   : > { %v1245_v62 = vsub.f32 %v1236_v50, %v1244_v61  ;;  %v2236_v61 = vld [vmem:[%s2854_s11 + $0x8] sm:$0xff]  }
 0x684   : > { %2119 = vmatpush3.bf16.msra.mxu1 %v2236_v61 }
 0x685   : > { %v1246_v3 = vmul.f32 1.442695, %v1245_v62 }
 0x687   : > { %2253 = vpow2.f32 %v1246_v3 }
 0x691   : > { %v2254_v63 = vpop.eup %2253 }
 0x692   : > { %v1248_v0 = vsel %vm698_vm5, %v2254_v63, 0.0 }
 0x693   : > { %1249 = vadd.xlane.f32.xlu0 %v1248_v0  ;;  %v1643_v0 = vld [vmem:[%s2852_s9] sm:$0x1] }
 0x6a9   : > { %1254 = vrot.lane.b32.xlu0 %v2611_v7, %s2351_s20  ;;  %s2273_s20 = scalar_lea.vmem %s2272_s0, 128 }
 0x6aa   : > { %p2275_p1 = scmp.lt.s32.totalorder %s2273_s20, %s2267_s16 }
 0x6ac   : > { %p2276_p2 = por %p2275_p1, %p2274_p0 }
 0x6ae   : > { %p2277_p3 = pnand %p2276_p2, %p2270_p13 }
 0x6eb   : > { %v1507_v5 = vpop.f32.mrb[24].mxu1 }
 0x6ec   : > { %v2102_v2 = vpop.f32.mrb[25].mxu1  ;;  %v1513_v4 = vsel %vm698_vm5, %v1507_v5, -inf }
 0x6ed   : > { %1514 = vmax.xlane.f32.xlu1 %v1513_v4  ;;  %v1510_v6 = vpop.f32.mrb[26].mxu1  ;;  %v1644_v2 = vunpack.c.l.bf16 %v1643_v0 }
 0x6ee   : > { %v2103_v8 = vpop.f32.mrb[27].mxu1 }
 0x6ef   : > { %v1648_v6 = vrot.slane %v1644_v2, %v2536_v10 }
 0x720   : > { %v1250_v9 = vpop.xlane.xlu0 %1249 }
 0x721   : > { %2255 = vrcp.f32 %v1250_v9 }
 0x724   : > { %v1255_v11 = vpop.permute.xlu0 %1254 }
 0x725   : > { %v1260_v12 = vsel %vm718_vm6, %v1255_v11, 0 }
 0x726   : > { %2081 = vmatpush3.bf16.msra.mxu0 %v1260_v12 }
 0x727   : > { %2086 = vmatprep.subr.bf16.mxu0 %v2331_v1 }
 0x72b   : > { %v2256_v13 = vpop.eup %2255 }
 0x72c   : > { %v1252_v14 = vmul.f32 %v2256_v13, %v2254_v63 }
 0x72e   : > { %v1253_v15 = vpack.c.bf16 %v1252_v14, %v1252_v14 }
 0x730   : > { %2083 = vmatmul.mubr.msk.bf16.vlgmr.msra.gmra.mrb[8].mxu0 %vm698_vm5, %v1253_v15  ;;  %v2237_v15 = vld [vmem:[%s2855_s12] sm:$0xff]  }
 0x731   : > { %2088 = vmatprep.mubr.msk.bf16.mxu0 %vm2332_vm0, %v2331_v1  ;;  %2087 = vmatpush3.bf16.msra.mxu0 %v1308_v20  ;;  %v2243_v20 = vld [vmem:[%s2855_s12 + $0x30] sm:$0xff]  }
 0x732   : > { %2104 = vmatprep.subr.bf16.mxu0 %v2331_v1 }
 0x77a   : > { %v1515_v16 = vpop.xlane.xlu1 %1514 }
 0x77b   : > { %v1516_v17 = vsub.f32 %v1507_v5, %v1515_v16  ;;  %v1650_v5 = vld [vmem:[%s2853_s10] sm:$0x1]  ;;  %v2238_v16 = vld [vmem:[%s2855_s12 + $0x8] sm:$0xff]  }
 0x77c   : > { %v1651_v4 = vunpack.c.l.bf16 %v1650_v5 }
 0x77d   : > { %v1517_v18 = vmul.f32 1.442695, %v1516_v17  ;;  %v2240_v17 = vld [vmem:[%s2855_s12 + $0x18] sm:$0xff]  }
 0x77e   : > { %v1655_v11 = vrot.slane %v1651_v4, %v2536_v10 }
 0x77f   : > { %2257 = vpow2.f32 %v1517_v18  ;;  %v2241_v18 = vld [vmem:[%s2855_s12 + $0x20] sm:$0xff]  }
 0x789   : > { %v2258_v21 = vpop.eup %2257 }
 0x78a   : > { %v1519_v22 = vsel %vm698_vm5, %v2258_v21, 0.0 }
 0x78b   : > { %1520 = vadd.xlane.f32.xlu1 %v1519_v22 }
 0x79c   : > { %1525 = vrot.lane.b32.xlu1 %v2611_v7, %s2864_s21  ;;  %s2801_s21 = scalar_lea.hbm %s2856_s13, %s1962_s24 }
 0x803   : > { %v1296_v23 = vpop.f32.mrb[8].mxu0 }
 0x804   : > { %v1302_v24 = vpack.c.bf16 %v1296_v23, %v1296_v23  ;;  %v2084_v25 = vpop.f32.mrb[9].mxu0 }
 0x805   : > { %v1299_v26 = vpop.f32.mrb[10].mxu0 }
 0x806   : > { %v2085_v27 = vpop.f32.mrb[11].mxu0  ;;  %2089 = vmatmul.mubr.msk.bf16.vlgmr.msra.gmra.mrb[12].mxu0 %vm698_vm5, %v1302_v24 }
 0x807   : > { %2106 = vmatprep.mubr.msk.bf16.mxu0 %vm2332_vm0, %v2331_v1 }
 0x818   : > { %v1521_v28 = vpop.xlane.xlu1 %1520 }
 0x819   : > { %2259 = vrcp.f32 %v1521_v28 }
 0x81c   : > { %v1526_v29 = vpop.permute.xlu1 %1525 }
 0x81d   : > { %v1531_v30 = vsel %vm718_vm6, %v1526_v29, 0 }
 0x81e   : > { %2105 = vmatpush3.bf16.msra.mxu0 %v1531_v30 }
 0x81f   : > { %2110 = vmatprep.subr.bf16.mxu0 %v2331_v1 }
 0x823   : > { %v2260_v31 = vpop.eup %2259 }
 0x824   : > { %v1523_v7 = vmul.f32 %v2260_v31, %v2258_v21  ;;  %v2244_v21 = vld [vmem:[%s2855_s12 + $0x38] sm:$0xff]  }
 0x826   : > { %v1524_v32 = vpack.c.bf16 %v1523_v7, %v1523_v7 }
 0x828   : > { %2107 = vmatmul.mubr.msk.bf16.vlgmr.msra.gmra.mrb[16].mxu0 %vm698_vm5, %v1524_v32 }
 0x829   : > { %2112 = vmatprep.mubr.msk.bf16.mxu0 %vm2332_vm0, %v2331_v1  ;;  %2111 = vmatpush3.bf16.msra.mxu0 %v1579_v34 }
 0x82a   : > { %2124 = vmatprep.subr.bf16.mxu0 %v2331_v1 }
 0x8d9   : > { %v1344_v35 = vpop.f32.mrb[12].mxu0 }
 0x8da   : > { %v1350_v36 = vadd.f32 %v1344_v35, %v2696_v47  ;;  %v2090_v37 = vpop.f32.mrb[13].mxu0  ;;  %v1627_v47 = vrot.slane %v1623_v48, %v2536_v10  ;;  %v2239_v10 = vld [vmem:[%s2855_s12 + $0x10] sm:$0xff]  }
 0x8db   : > { %v1347_v38 = vpop.f32.mrb[14].mxu0 }
 0x8dc   : > { %v2091_v39 = vpop.f32.mrb[15].mxu0 }
 0x8fb   : > { %v1567_v40 = vpop.f32.mrb[16].mxu0 }
 0x8fc   : > { %v1573_v42 = vpack.c.bf16 %v1567_v40, %v1567_v40  ;;  %v2108_v43 = vpop.f32.mrb[17].mxu0 }
 0x8fd   : > { %v1570_v44 = vpop.f32.mrb[18].mxu0 }
 0x8fe   : > { %v2109_v45 = vpop.f32.mrb[19].mxu0  ;;  %2113 = vmatmul.mubr.msk.bf16.vlgmr.msra.gmra.mrb[20].mxu0 %vm698_vm5, %v1573_v42 }
 0x8ff   : > { %2140 = vmatprep.mubr.msk.bf16.mxu0 %vm2332_vm0, %v2331_v1  ;;  %2125 = vmatpush3.bf16.msra.mxu0 %v2237_v15  ;;  %v2364_v45 = vmov -1.0  }
 0x900   : > { %2126 = vmatprep.subr.bf16.mxu0 %v2331_v1 }
 0x903   : > { %2127 = vmatpush3.bf16.msra.mxu0 %v2238_v16 }
 0x904   : > { %2128 = vmatprep.subr.bf16.mxu0 %v2331_v1 }
 0x907   : > { %2129 = vmatpush3.bf16.msra.mxu0 %v2239_v10 }
 0x908   : > { %2130 = vmatprep.subr.bf16.mxu0 %v2331_v1 }
 0x90b   : > { %2131 = vmatpush3.bf16.msra.mxu0 %v2240_v17 }
 0x90c   : > { %2132 = vmatprep.subr.bf16.mxu0 %v2331_v1 }
 0x90f   : > { %2133 = vmatpush3.bf16.msra.mxu0 %v2241_v18 }
 0x910   : > { %2134 = vmatprep.subr.bf16.mxu0 %v2331_v1 }
 0x913   : > { %2135 = vmatpush3.bf16.msra.mxu0 %v2242_v19 }
 0x914   : > { %2136 = vmatprep.subr.bf16.mxu0 %v2331_v1 }
 0x917   : > { %2137 = vmatpush3.bf16.msra.mxu0 %v2243_v20 }
 0x918   : > { %2138 = vmatprep.subr.bf16.mxu0 %v2331_v1 }
 0x91b   : > { %2139 = vmatpush3.bf16.msra.mxu0 %v2244_v21 }
 0x9d1   : > { %v1615_v41 = vpop.f32.mrb[20].mxu0 }
 0x9d2   : > { %v1621_v49 = vadd.f32 %v1615_v41, %v1350_v36  ;;  %v2114_v50 = vpop.f32.mrb[21].mxu0 }
 0x9d3   : > { %v1618_v51 = vpop.f32.mrb[22].mxu0 }
 0x9d4   : > { %v2115_v52 = vpop.f32.mrb[23].mxu0  ;;  %v1628_v53 = vadd.f32 %v1627_v47, %v1621_v49 }
 0x9d6   : > { %v1629_v54 = vsel %vm460_vm1, %v1628_v53, 0.0 }
 0x9d7   : > { %1630 = vadd.xlane.f32.xlu0 %v1629_v54 }
 0xa64   : > { %v1631_v55 = vpop.xlane.xlu0 %1630 }
 0xa65   : > { %v1633_v56 = vmul.f32 0.03125, %v1631_v55 }
 0xa67   : > { %v1634_v57 = vsub.f32 %v1628_v53, %v1633_v56 }
 0xa69   : > { %v1635_v58 = vmul.f32 %v1634_v57, %v1634_v57 }
 0xa6b   : > { %v1636_v59 = vsel %vm460_vm1, %v1635_v58, 0.0 }
 0xa6c   : > { %1637 = vadd.xlane.f32.xlu1 %v1636_v59 }
 0xaf9   : > { %v1638_v62 = vpop.xlane.xlu1 %1637 }
 0xafa   : > { %v1639_v3 = vmul.f32 0.03125, %v1638_v62 }
 0xafc   : > { %v1640_v63 = vadd.f32 1e-05, %v1639_v3 }
 0xafe   : > { %2261 = vrsqrt.f32 %v1640_v63 }
 0xb08   : > { %v2262_v8 = vpop.eup %2261 }
 0xb09   : > { %v1642_v9 = vmul.f32 %v2262_v8, %v1634_v57 }
 0xb0b   : > { %v1649_v12 = vmul.f32 %v1648_v6, %v1642_v9 }
 0xb0d   : > { %v1656_v13 = vadd.f32 %v1655_v11, %v1649_v12 }
 0xb0f   : > { %v1657_v14 = vpack.c.bf16 %v1656_v13, %v1656_v13 }
 0xb11   : > { %2121 = vmatmul.mubr.msk.bf16.vlgmr.msra.gmra.mrb[28].mxu1 %vm460_vm1, %v1657_v14 }
 0xbe4   : > { %v1711_v22 = vpop.f32.mrb[28].mxu1 }
 0xbe5   : > { %v1718_v23 = vmul.f32 0.70710677, %v1711_v22  ;;  %v2122_v24 = vpop.f32.mrb[29].mxu1  ;;  %v1717_v47 = vmul.f32 0.5, %v1711_v22 }
 0xbe6   : > { %v1714_v25 = vpop.f32.mrb[30].mxu1 }
 0xbe7   : > { %v1721_v26 = vand.u32 2147483647, %v1718_v23  ;;  %v2123_v27 = vpop.f32.mrb[31].mxu1  ;;  %vm1719_vm7 = vcmp.ge.f32.partialorder %v1718_v23, 0.0 }
 0xbe8   : > { %v1720_v46 = vsel %vm1719_vm7, 1.0, %v2364_v45 }
 0xbe9   : > { %v1722_v28 = vmul.f32 0.3275911, %v1721_v26  ;;  %v1735_v30 = vsub.f32 0.0, %v1721_v26 }
 0xbeb   : > { %v1723_v29 = vadd.f32 1.0, %v1722_v28  ;;  %v1736_v7 = vmul.f32 %v1735_v30, %v1721_v26 }
 0xbed   : > { %2263 = vrcp.f32 %v1723_v29  ;;  %v1737_v1 = vmul.f32 1.442695, %v1736_v7 }
 0xbef   : > { %2265 = vpow2.f32 %v1737_v1 }
 0xbf7   : > { %v2264_v31 = vpop.eup %2263 }
 0xbf8   : > { %v1726_v32 = vmul.f32 1.0614054, %v2264_v31 }
 0xbf9   : > { %v2266_v42 = vpop.eup %2265 }
 0xbfa   : > { %v1727_v33 = vadd.f32 -1.4531521, %v1726_v32 }
 0xbfc   : > { %v1728_v34 = vmul.f32 %v2264_v31, %v1727_v33 }
 0xbfe   : > { %v1729_v35 = vadd.f32 1.4214138, %v1728_v34 }
 0xc00   : > { %v1730_v36 = vmul.f32 %v2264_v31, %v1729_v35 }
 0xc02   : > { %v1731_v37 = vadd.f32 -0.28449672, %v1730_v36 }
 0xc04   : > { %v1732_v38 = vmul.f32 %v2264_v31, %v1731_v37 }
 0xc06   : > { %v1733_v39 = vadd.f32 0.2548296, %v1732_v38 }
 0xc08   : > { %v1734_v40 = vmul.f32 %v2264_v31, %v1733_v39 }
 0xc0a   : > { %v1739_v43 = vmul.f32 %v2266_v42, %v1734_v40 }
 0xc0c   : > { %v1740_v44 = vsub.f32 1.0, %v1739_v43 }
 0xc0e   : > { %v1741_v48 = vmul.f32 %v1740_v44, %v1720_v46 }
 0xc10   : > { %v1742_v41 = vadd.f32 1.0, %v1741_v48 }
 0xc12   : > { %v1743_v49 = vmul.f32 %v1742_v41, %v1717_v47 }
 0xc14   : > { %v1744_v50 = vpack.c.bf16 %v1743_v49, %v1743_v49 }
 0xc16   : > { %2141 = vmatmul.mubr.bf16.vlgmr.msra.gmra.mrb[24].mxu0 %v1744_v50 }
 0xce9   : > { %v1843_v51 = vpop.f32.mrb[24].mxu0 }
 0xcea   : > { %v1849_v52 = vpack.c.bf16 %v1843_v51, %v1843_v51  ;;  %v2142_v53 = vpop.f32.mrb[25].mxu0 }
 0xceb   : > { %v1846_v54 = vpop.f32.mrb[26].mxu0 }
 0xcec   : > { %v2143_v55 = vpop.f32.mrb[27].mxu0  ;;  %1851 = vst.msk [vmem:[%s431_s15] sm:$0xf] %vm1850_vm8, %v1849_v52 }
 0xced   : > { %2280 = shalt.err (!%p2277_p3)
}
 0xcee   : > { %s2281_s1 = scalar_lea.hbm %s2801_s21, 64  ;;  %s2285_s23 = scalar_lea.hbm %s2856_s13, 128 }
 0xcef   : > { %p2282_p4 = scmp.ne.s32.totalorder %s2801_s21, %s2281_s1  ;;  %p2286_p9 = scmp.lt.u32.totalorder %s2801_s21, %s2856_s13 }
 0xcf0   : > { %p2287_p10 = scmp.lt.u32.totalorder %s2285_s23, %s2281_s1  ;;  %p2289_p12 = scmp.lt.u32.totalorder %s2281_s1, %s2801_s21 }
 0xcf1   : > { %p2283_p7 = pnand %p2282_p4, %p2474_p5 }
 0xcf2   : > { %p2288_p11 = por %p2287_p10, %p2286_p9 }
 0xcf3   : > { %p2284_p8 = pneg %p2283_p7 }
 0xcf4   : > { %p2290_p13 = por %p2289_p12, %p2288_p11 }
 0xcf6   : > { %p2291_p0 = pnand %p2290_p13, %p2284_p8 }
 0xcf8   : > { %2294 = shalt.err (!%p2291_p0)
}
 0xcf9   : > { %2160 = dma.vmem_to_hbm [thread:$0]  (%p2474_p5), %s2803_s22, 64, %s2801_s21, %s1853_s29  }
 0xcfa PF: > { %p2166_p1 = scmp.ge.s32.totalorder %s2329_s28, 2  ;;  %s1878_s16 = sand.u32 1, %s2317_s25  }
 0xcfb   : > { %s1879_s20 = scalar_lea.sflag [#allocation5], %s1878_s16 }
 0xcfc   : > { %p2163_p2 = pnand %p2166_p1, %p2478_p6 }
 0xcfe   : > { %2312 = dma.done.wait (!%p2163_p2), %s1879_s20, 64  }
 0xcff   : > { %2314 = vsyncadd (!%p2163_p2), %s1879_s20, 4294967232  ;;  %p23_p3 = scmp.ge.s32.totalorder %s2461_s14, 4   ;;  %s2865_s25 = smov %s2321_s26 }
 0xd00   : > { %s2866_s26 = smov %s2325_s27  ;;  %s2867_s27 = smov %s2472_s17 }
 0xd01   : > { %s2868_s28 = smov %s2461_s14  ;;  %25 = sbr.rel (!%p23_p3) target bundleno = 6 (0x6), region = 107 }
 0xd08   :  { %1884 = vsyncpa [#allocation5], 1 }
 0xd09   :  { %1886 = vsyncpa [#allocation5 + $0x1], 1 }

</bundles_post_ra>
